<compile_context>
chip_gen: v7x
topology: tpu7x:2x2x1
jax: 0.10.0
libtpu: 0.0.40
codegen_flags: <defaults>
</compile_context>

<pallas_src>
from typing import NamedTuple

import jax
import jax.numpy as jnp
from jax.experimental import pallas as pl
from jax.experimental.pallas import tpu as pltpu


def _round_up(v: int, m: int) -> int:
    return ((v + m - 1) // m) * m


def _nbytes(a) -> int:
    return a.size * a.dtype.itemsize


def _vmem_capacity_bytes() -> int:
    """Physical VMEM of the local TPU generation (fallback: conservative 64 MiB)."""
    cap = None
    try:
        cap = getattr(pltpu.get_tpu_info(), "vmem_capacity_bytes", None)
    except Exception:
        cap = None
    return int(cap) if cap else 64 * 1024 * 1024


# ----------------------------------------------------------------------------
# Kernels
# ----------------------------------------------------------------------------
def _gcn_fused_kernel(x_ref, w1_ref, b1_ref, w2_ref, b2m_ref, adj_ref, out_ref):
    """Fully VMEM-resident fused forward (small/medium graphs)."""
    adj = adj_ref[...]                                                # (Np,Np) bf16

    # gc1: h = relu(adj @ (x @ W1) + b1)   (bias+relu+downcast fused; h kept bf16)
    s1 = jnp.dot(x_ref[...], w1_ref[...],
                 preferred_element_type=jnp.float32).astype(jnp.bfloat16)
    h = jnp.maximum(jnp.dot(adj, s1, preferred_element_type=jnp.float32)
                    + b1_ref[...], 0.0).astype(jnp.bfloat16)

    # dropout(training=False) == identity

    # gc2: z = adj @ (h @ W2) + b2   (padded class lanes of b2m are -1e30)
    s2 = jnp.dot(h, w2_ref[...],
                 preferred_element_type=jnp.float32).astype(jnp.bfloat16)
    z = jnp.dot(adj, s2, preferred_element_type=jnp.float32) + b2m_ref[...]

    # row-wise log_softmax (padded lanes already at -1e30 via b2m)
    m = jnp.max(z, axis=1, keepdims=True)
    s = z - m
    out_ref[...] = (s - jnp.log(jnp.sum(jnp.exp(s), axis=1, keepdims=True))
                    ).astype(out_ref.dtype)


def _proj_kernel(x_ref, w1_ref, s1_ref):
    """s1 = x @ W1 for one row tile."""
    s1_ref[...] = jnp.dot(x_ref[...], w1_ref[...],
                          preferred_element_type=jnp.float32).astype(s1_ref.dtype)


def _layer1_kernel(adj_ref, s1_ref, b1_ref, w2_ref, s2_ref):
    """s2 = relu(adj_tile @ s1 + b1) @ W2 for one row tile (adj streamed)."""
    h = jnp.maximum(jnp.dot(adj_ref[...], s1_ref[...],
                            preferred_element_type=jnp.float32)
                    + b1_ref[...], 0.0).astype(jnp.bfloat16)
    s2_ref[...] = jnp.dot(h, w2_ref[...],
                          preferred_element_type=jnp.float32).astype(s2_ref.dtype)


def _layer2_kernel(adj_ref, s2_ref, b2m_ref, out_ref):
    """out = log_softmax(adj_tile @ s2 + b2) for one row tile (adj streamed)."""
    z = jnp.dot(adj_ref[...], s2_ref[...],
                preferred_element_type=jnp.float32) + b2m_ref[...]
    m = jnp.max(z, axis=1, keepdims=True)
    s = z - m
    out_ref[...] = (s - jnp.log(jnp.sum(jnp.exp(s), axis=1, keepdims=True))
                    ).astype(out_ref.dtype)


# ----------------------------------------------------------------------------
# One-time preparation (padding + bf16 cast hoisted out of the per-call path)
# ----------------------------------------------------------------------------
class PreparedGCN(NamedTuple):
    x_p: jax.Array     # (Np, Fp) bf16
    adj_p: jax.Array   # (Np, Np) bf16
    w1_p: jax.Array    # (Fp, Hp) bf16
    b1_p: jax.Array    # (1, Hp)  f32
    w2_p: jax.Array    # (Hp, Cp) bf16
    b2m_p: jax.Array   # (1, Cp)  f32, padded class lanes = -1e30 (bakes softmax mask)
    n: int
    nclass: int
    tile_rows: int


def prepare_gcn(x, adj, params, *, tile_rows: int = 256) -> PreparedGCN:
    """Pad/cast operands once; reuse the result across forward calls."""
    assert tile_rows % 128 == 0, "tile_rows must be a multiple of 128"
    w1, b1, w2, b2 = params
    n, nfeat = x.shape
    nhid, nclass = w1.shape[1], w2.shape[1]

    n_p = _round_up(n, tile_rows)
    f_p = _round_up(nfeat, 128)
    h_p = _round_up(nhid, 128)
    c_p = _round_up(nclass, 128)

    def pad2(a, rows, cols, dtype):
        buf = jnp.zeros((rows, cols), dtype)
        return buf.at[: a.shape[0], : a.shape[1]].set(a.astype(dtype))

    x_p = pad2(x, n_p, f_p, jnp.bfloat16)
    adj_p = pad2(adj, n_p, n_p, jnp.bfloat16)
    w1_p = pad2(w1, f_p, h_p, jnp.bfloat16)
    w2_p = pad2(w2, h_p, c_p, jnp.bfloat16)
    b1_p = pad2(b1.reshape(1, -1), 1, h_p, jnp.float32)
    # Padded class lanes get -1e30 so the log_softmax max/sum ignore them
    # (the bias add already touches every lane: the mask is free).
    b2m_p = jnp.full((1, c_p), -1e30, jnp.float32).at[0, :nclass].set(
        b2.astype(jnp.float32))

    return PreparedGCN(x_p, adj_p, w1_p, b1_p, w2_p, b2m_p, n, nclass, tile_rows)


# ----------------------------------------------------------------------------
# Forward
# ----------------------------------------------------------------------------
def _run_fused(prep: PreparedGCN, vmem_limit: int):
    n_p = prep.adj_p.shape[0]
    f_p = prep.x_p.shape[1]
    h_p = prep.w1_p.shape[1]
    c_p = prep.w2_p.shape[1]

    flops = (2 * n_p * f_p * h_p + 2 * n_p * n_p * h_p
             + 2 * n_p * h_p * c_p + 2 * n_p * n_p * c_p)
    bytes_accessed = (_nbytes(prep.x_p) + _nbytes(prep.adj_p) + _nbytes(prep.w1_p)
                      + _nbytes(prep.w2_p) + _nbytes(prep.b1_p) + _nbytes(prep.b2m_p)
                      + n_p * c_p * 4)

    return pl.pallas_call(
        _gcn_fused_kernel,
        out_shape=jax.ShapeDtypeStruct((n_p, c_p), jnp.float32),
        in_specs=[
            pl.BlockSpec(prep.x_p.shape, lambda: (0, 0)),
            pl.BlockSpec(prep.w1_p.shape, lambda: (0, 0)),
            pl.BlockSpec(prep.b1_p.shape, lambda: (0, 0)),
            pl.BlockSpec(prep.w2_p.shape, lambda: (0, 0)),
            pl.BlockSpec(prep.b2m_p.shape, lambda: (0, 0)),
            pl.BlockSpec(prep.adj_p.shape, lambda: (0, 0)),
        ],
        out_specs=pl.BlockSpec((n_p, c_p), lambda: (0, 0)),
        cost_estimate=pl.CostEstimate(
            flops=flops, transcendentals=n_p * c_p + n_p,
            bytes_accessed=bytes_accessed),
        compiler_params=pltpu.CompilerParams(vmem_limit_bytes=vmem_limit),
    )(prep.x_p, prep.w1_p, prep.b1_p, prep.w2_p, prep.b2m_p, prep.adj_p)


def _run_tiled(prep: PreparedGCN, vmem_limit: int):
    n_p = prep.adj_p.shape[0]
    f_p = prep.x_p.shape[1]
    h_p = prep.w1_p.shape[1]
    c_p = prep.w2_p.shape[1]
    tm = prep.tile_rows
    grid = (n_p // tm,)
    cp = pltpu.CompilerParams(dimension_semantics=("parallel",),
                              vmem_limit_bytes=vmem_limit)

    # 1) s1 = x @ W1                             (row-tiled, parallel)
    s1 = pl.pallas_call(
        _proj_kernel,
        grid=grid,
        in_specs=[pl.BlockSpec((tm, f_p), lambda i: (i, 0)),
                  pl.BlockSpec((f_p, h_p), lambda i: (0, 0))],
        out_specs=pl.BlockSpec((tm, h_p), lambda i: (i, 0)),
        out_shape=jax.ShapeDtypeStruct((n_p, h_p), jnp.bfloat16),
        compiler_params=cp,
    )(prep.x_p, prep.w1_p)

    # 2) s2 = relu(adj @ s1 + b1) @ W2           (adj streamed in row tiles)
    s2 = pl.pallas_call(
        _layer1_kernel,
        grid=grid,
        in_specs=[pl.BlockSpec((tm, n_p), lambda i: (i, 0)),
                  pl.BlockSpec((n_p, h_p), lambda i: (0, 0)),
                  pl.BlockSpec((1, h_p), lambda i: (0, 0)),
                  pl.BlockSpec((h_p, c_p), lambda i: (0, 0))],
        out_specs=pl.BlockSpec((tm, c_p), lambda i: (i, 0)),
        out_shape=jax.ShapeDtypeStruct((n_p, c_p), jnp.bfloat16),
        compiler_params=cp,
    )(prep.adj_p, s1, prep.b1_p, prep.w2_p)

    # 3) out = log_softmax(adj @ s2 + b2)        (second pipelined pass over adj)
    return pl.pallas_call(
        _layer2_kernel,
        grid=grid,
        in_specs=[pl.BlockSpec((tm, n_p), lambda i: (i, 0)),
                  pl.BlockSpec((n_p, c_p), lambda i: (0, 0)),
                  pl.BlockSpec((1, c_p), lambda i: (0, 0))],
        out_specs=pl.BlockSpec((tm, c_p), lambda i: (i, 0)),
        out_shape=jax.ShapeDtypeStruct((n_p, c_p), jnp.float32),
        compiler_params=cp,
    )(prep.adj_p, s2, prep.b2m_p)


def _fused_footprint_bytes(prep: PreparedGCN) -> int:
    """Conservative VMEM estimate of the fused path (inputs x2 for potential
    double buffering + f32/bf16 intermediates)."""
    n_p = prep.adj_p.shape[0]
    h_p = prep.w1_p.shape[1]
    c_p = prep.w2_p.shape[1]
    inputs = (_nbytes(prep.adj_p) + _nbytes(prep.x_p) + _nbytes(prep.w1_p)
              + _nbytes(prep.w2_p) + _nbytes(prep.b1_p) + _nbytes(prep.b2m_p))
    temps = n_p * h_p * 6 + n_p * c_p * 10     # s1/h (f32+bf16), s2 (f32+bf16), z f32
    out = n_p * c_p * 4
    return 2 * inputs + temps + 2 * out


def gcn_forward_prepared(prep: PreparedGCN, *, force_tiled=None):
    cap = _vmem_capacity_bytes()
    vmem_limit = int(cap * 7 // 8)             # ≈112 MiB v5e/v6e, ≈56 MiB v7x
    if force_tiled is None:
        use_tiled = _fused_footprint_bytes(prep) > int(cap * 3 // 4)
    else:
        use_tiled = bool(force_tiled)
    out_p = _run_tiled(prep, vmem_limit) if use_tiled else _run_fused(prep, vmem_limit)
    return out_p[: prep.n, : prep.nclass]


def gcn_forward(x, adj, params, dropout_p=0.5, training=False, *, tile_rows=256):
    """One-shot convenience wrapper. For repeated calls, use prepare_gcn() once
    and gcn_forward_prepared() per step (padding/casting hoisted out)."""
    del dropout_p, training  # eval-mode dropout is the identity
    return gcn_forward_prepared(prepare_gcn(x, adj, params, tile_rows=tile_rows))


# ----------------------------------------------------------------------------
# Deterministic parameter init (mirrors pygcn GraphConvolution.reset_parameters:
# uniform(-stdv, stdv) with stdv = 1/sqrt(out_features))
# ----------------------------------------------------------------------------
def init_params(key, nfeat, nhid, nclass):
    k1, k2, k3, k4 = jax.random.split(key, 4)
    stdv1 = 1.0 / jnp.sqrt(nhid)
    stdv2 = 1.0 / jnp.sqrt(nclass)
    w1 = jax.random.uniform(k1, (nfeat, nhid), jnp.float32, -stdv1, stdv1)
    b1 = jax.random.uniform(k2, (nhid,), jnp.float32, -stdv1, stdv1)
    w2 = jax.random.uniform(k3, (nhid, nclass), jnp.float32, -stdv2, stdv2)
    b2 = jax.random.uniform(k4, (nclass,), jnp.float32, -stdv2, stdv2)
    return w1, b1, w2, b2


if __name__ == "__main__":
    # Small demo shapes; tile_rows=128 gives a 3-tile grid so the streamed /
    # parallel path is exercised alongside the fused path.
    N, NFEAT, NHID, NCLASS = 300, 96, 32, 7

    key = jax.random.PRNGKey(0)
    kx, kadj, kparams = jax.random.split(key, 3)

    x = jax.random.normal(kx, (N, NFEAT), jnp.float32)

    # Symmetric, row-normalized adjacency with self-loops (typical GCN input)
    a = (jax.random.uniform(kadj, (N, N)) < 0.05).astype(jnp.float32)
    a = jnp.maximum(a, a.T) + jnp.eye(N, dtype=jnp.float32)
    adj = a / jnp.sum(a, axis=1, keepdims=True)

    params = init_params(kparams, NFEAT, NHID, NCLASS)

    prep = prepare_gcn(x, adj, params, tile_rows=128)   # pad/cast once, reuse
    out_fused = gcn_forward_prepared(prep, force_tiled=False)
    out_tiled = gcn_forward_prepared(prep, force_tiled=True)
    jax.block_until_ready((out_fused, out_tiled))

    assert out_fused.shape == (N, NCLASS)
    assert out_tiled.shape == (N, NCLASS)
    # rows of log_softmax exponentiate to ~1
    assert jnp.allclose(jnp.sum(jnp.exp(out_fused), axis=1), 1.0, atol=1e-3)
    assert jnp.allclose(jnp.sum(jnp.exp(out_tiled), axis=1), 1.0, atol=1e-3)
    # fused and tiled paths agree (both use bf16 operands, f32 accumulation)
    assert jnp.allclose(out_fused, out_tiled, atol=3e-2, rtol=3e-2)

    print("KERNEL_OK")
</pallas_src>

<mosaic_0001>
module attributes {stable_mosaic.version = 11 : i64} {
  func.func @_gcn_fused_kernel(%arg0: memref<384x128xbf16, #tpu.memory_space<vmem>>, %arg1: memref<128x128xbf16, #tpu.memory_space<vmem>>, %arg2: memref<1x128xf32, #tpu.memory_space<vmem>>, %arg3: memref<128x128xbf16, #tpu.memory_space<vmem>>, %arg4: memref<1x128xf32, #tpu.memory_space<vmem>>, %arg5: memref<384x384xbf16, #tpu.memory_space<vmem>>, %arg6: memref<384x128xf32, #tpu.memory_space<vmem>>) attributes {dimension_semantics = [], scalar_prefetch = 0 : i64, scratch_operands = 0 : i64, tpu.core_type = #tpu.core_type<tc>} {
    %c0 = arith.constant 0 : index
    %c0_0 = arith.constant 0 : index
    %0 = vector.load %arg5[%c0, %c0_0] : memref<384x384xbf16, #tpu.memory_space<vmem>>, vector<384x384xbf16>
    %c0_1 = arith.constant 0 : index
    %c0_2 = arith.constant 0 : index
    %1 = vector.load %arg0[%c0_1, %c0_2] : memref<384x128xbf16, #tpu.memory_space<vmem>>, vector<384x128xbf16>
    %c0_3 = arith.constant 0 : index
    %c0_4 = arith.constant 0 : index
    %2 = vector.load %arg1[%c0_3, %c0_4] : memref<128x128xbf16, #tpu.memory_space<vmem>>, vector<128x128xbf16>
    %cst = arith.constant dense<0.000000e+00> : vector<384x128xf32>
    %3 = tpu.matmul %1, %2, %cst {dimension_numbers = #tpu.dot_dimension_numbers<[1], [0], [0], [1], [0, 0, 1, 1], [], []>} : vector<384x128xbf16>, vector<128x128xbf16>, vector<384x128xf32> -> vector<384x128xf32>
    %4 = arith.truncf %3 : vector<384x128xf32> to vector<384x128xbf16>
    %cst_5 = arith.constant dense<0.000000e+00> : vector<384x128xf32>
    %5 = tpu.matmul %0, %4, %cst_5 {dimension_numbers = #tpu.dot_dimension_numbers<[1], [0], [0], [1], [0, 0, 1, 1], [], []>} : vector<384x384xbf16>, vector<384x128xbf16>, vector<384x128xf32> -> vector<384x128xf32>
    %c0_6 = arith.constant 0 : index
    %c0_7 = arith.constant 0 : index
    %6 = vector.load %arg2[%c0_6, %c0_7] : memref<1x128xf32, #tpu.memory_space<vmem>>, vector<1x128xf32>
    %7 = vector.broadcast %6 : vector<1x128xf32> to vector<384x128xf32>
    %8 = arith.addf %5, %7 : vector<384x128xf32>
    %cst_8 = arith.constant 0.000000e+00 : f32
    %9 = vector.broadcast %cst_8 : f32 to vector<384x128xf32>
    %10 = arith.maximumf %8, %9 : vector<384x128xf32>
    %11 = arith.truncf %10 : vector<384x128xf32> to vector<384x128xbf16>
    %c0_9 = arith.constant 0 : index
    %c0_10 = arith.constant 0 : index
    %12 = vector.load %arg3[%c0_9, %c0_10] : memref<128x128xbf16, #tpu.memory_space<vmem>>, vector<128x128xbf16>
    %cst_11 = arith.constant dense<0.000000e+00> : vector<384x128xf32>
    %13 = tpu.matmul %11, %12, %cst_11 {dimension_numbers = #tpu.dot_dimension_numbers<[1], [0], [0], [1], [0, 0, 1, 1], [], []>} : vector<384x128xbf16>, vector<128x128xbf16>, vector<384x128xf32> -> vector<384x128xf32>
    %14 = arith.truncf %13 : vector<384x128xf32> to vector<384x128xbf16>
    %cst_12 = arith.constant dense<0.000000e+00> : vector<384x128xf32>
    %15 = tpu.matmul %0, %14, %cst_12 {dimension_numbers = #tpu.dot_dimension_numbers<[1], [0], [0], [1], [0, 0, 1, 1], [], []>} : vector<384x384xbf16>, vector<384x128xbf16>, vector<384x128xf32> -> vector<384x128xf32>
    %c0_13 = arith.constant 0 : index
    %c0_14 = arith.constant 0 : index
    %16 = vector.load %arg4[%c0_13, %c0_14] : memref<1x128xf32, #tpu.memory_space<vmem>>, vector<1x128xf32>
    %17 = vector.broadcast %16 : vector<1x128xf32> to vector<384x128xf32>
    %18 = arith.addf %15, %17 : vector<384x128xf32>
    %cst_15 = arith.constant dense<0xFF800000> : vector<384xf32>
    %19 = vector.multi_reduction <maximumf>, %18, %cst_15 [1] : vector<384x128xf32> to vector<384xf32>
    %20 = vector.shape_cast %19 : vector<384xf32> to vector<384x1xf32>
    %21 = vector.broadcast %20 : vector<384x1xf32> to vector<384x128xf32>
    %22 = arith.subf %18, %21 : vector<384x128xf32>
    %23 = math.exp %22 : vector<384x128xf32>
    %cst_16 = arith.constant dense<0.000000e+00> : vector<384xf32>
    %24 = vector.multi_reduction <add>, %23, %cst_16 [1] : vector<384x128xf32> to vector<384xf32>
    %25 = vector.shape_cast %24 : vector<384xf32> to vector<384x1xf32>
    %26 = math.log %25 : vector<384x1xf32>
    %27 = vector.broadcast %26 : vector<384x1xf32> to vector<384x128xf32>
    %28 = arith.subf %22, %27 : vector<384x128xf32>
    %c0_17 = arith.constant 0 : index
    %c0_18 = arith.constant 0 : index
    %29 = vector.load %arg6[%c0_17, %c0_18] : memref<384x128xf32, #tpu.memory_space<vmem>>, vector<384x128xf32>
    tpu.vector_store %arg6[%c0_17, %c0_18], %28 {strides = array<i32>} : memref<384x128xf32, #tpu.memory_space<vmem>>, vector<384x128xf32>,
    return
  }
}

</mosaic_0001>

<bundles_post_ra>
// kernel: tpu_custom_call.1
= control target key start
LH: loop header
LB: loop body
LE: loop exit
PB: predicated region body
PF: predicated region fallthrough
CT: control target
= control target key end

     0   :  { %11 = vsyncpa [#allocation3], 0  ;;  %s4666_s0 = inlined_call_operand.hbm [shape: bf16[384,128], index: 0, kind: input, shape index: {}]   ;;  %s4667_s1 = inlined_call_operand.hbm [shape: bf16[128,128], index: 1, kind: input, shape index: {}]   ;;  %s4668_s2 = inlined_call_operand.vmem [shape: f32[1,128], index: 2, kind: input, shape index: {}]   ;;  %s4669_s3 = inlined_call_operand.hbm [shape: bf16[128,128], index: 3, kind: input, shape index: {}]   ;;  %s4670_s4 = inlined_call_operand.vmem [shape: f32[1,128], index: 4, kind: input, shape index: {}]   ;;  %s4671_s5 = inlined_call_operand.hbm [shape: bf16[384,384], index: 5, kind: input, shape index: {}]   ;;  %s4672_s6 = inlined_call_operand.hbm [shape: f32[384,128], index: 6, kind: output, shape index: {}]  }
   0x1   :  { %12 = vsyncpa [#allocation6], 0 }
   0x2   :  { %13 = vsyncpa [#allocation9], 0 }
   0x3   :  { %14 = vsyncpa [#allocation4], 0  ;;  %s3938_s21 = smov [#allocation5]   ;;  %s3939_s23 = smov [#allocation2]  }
   0x4   :  { %s32_s22 = sshll.u32 %s3938_s21, 4  ;;  %s20_s24 = sshll.u32 %s3939_s23, 4  ;;  %s33_s22 = int_to_ptr.vmem [resolvable:$true] %s32_s22  ;;  %s3985_s24 = int_to_ptr.vmem [resolvable:$true] %s20_s24 }
   0x5   :  { %s3820_s27 = scalar_lea.hbm %s4667_s1, 1024 }
   0x6   :  { %p3821_p0 = scmp.ne.s32.totalorder %s4667_s1, %s3820_s27  ;;  %p3824_p1 = scmp.lt.u32.totalorder %s3820_s27, %s4667_s1 }
   0x8   :  { %p3826_p2 = pnand %p3824_p1, %p3821_p0 }
   0xa   :  { %3829 = shalt.err (!%p3826_p2)
}
   0xb   :  { %s3830_s8 = scalar_lea.vmem %s33_s22, 1024  ;;  %p3835_p4 = scmp.lt.s32.totalorder %s33_s22, %s33_s22 }
   0xc   :  { %p3831_p3 = scmp.ne.s32.totalorder %s33_s22, %s3830_s8  ;;  %p3836_p5 = scmp.lt.s32.totalorder %s3830_s8, %s3830_s8 }
   0xe   :  { %p3837_p6 = por %p3836_p5, %p3835_p4 }
  0x10   :  { %p3838_p7 = pnand %p3837_p6, %p3831_p3 }
  0x12   :  { %3841 = shalt.err (!%p3838_p7)
}
  0x13   :  { %s3940_s9 = smov 64   ;;  %s3941_s10 = smov 4  }
  0x14   :  { %38 = dma.hbm_to_vmem [thread:$0]  %s4667_s1, 1024, %s33_s22, [#allocation6], %s3940_s9, %s3940_s9, %s3941_s10  }
  0x15   :  { %s3842_s15 = scalar_lea.hbm %s4666_s0, 3072 }
  0x16   :  { %p3843_p8 = scmp.ne.s32.totalorder %s4666_s0, %s3842_s15  ;;  %p3846_p9 = scmp.lt.u32.totalorder %s3842_s15, %s4666_s0 }
  0x18   :  { %p3848_p10 = pnand %p3846_p9, %p3843_p8 }
  0x1a   :  { %3851 = shalt.err (!%p3848_p10)
}
  0x1b   :  { %s3852_s20 = scalar_lea.vmem %s3985_s24, 3072  ;;  %p3857_p12 = scmp.lt.s32.totalorder %s3985_s24, %s3985_s24 }
  0x1c   :  { %p3853_p11 = scmp.ne.s32.totalorder %s3985_s24, %s3852_s20  ;;  %p3858_p13 = scmp.lt.s32.totalorder %s3852_s20, %s3852_s20 }
  0x1e   :  { %p3859_p0 = por %p3858_p13, %p3857_p12 }
  0x20   :  { %p3860_p1 = pnand %p3859_p0, %p3853_p11 }
  0x22   :  { %3863 = shalt.err (!%p3860_p1)
}
  0x23   :  { %26 = dma.hbm_to_vmem [thread:$0]  %s4666_s0, 3072, %s3985_s24, [#allocation3], %s3940_s9, %s3940_s9, %s3941_s10  }
  0x24   :  { %s3942_s22 = smov [#allocation7]   ;;  %s3943_s25 = smov [#allocation8]  }
  0x25   :  { %s46_s23 = sshll.u32 %s3942_s22, 4  ;;  %s60_s26 = sshll.u32 %s3943_s25, 4  ;;  %s47_s23 = int_to_ptr.vmem [resolvable:$true] %s46_s23  ;;  %s4022_s26 = int_to_ptr.vmem [resolvable:$true] %s60_s26 }
  0x26   :  { %s3864_s29 = scalar_lea.hbm %s4669_s3, 1024 }
  0x27   :  { %p3865_p2 = scmp.ne.s32.totalorder %s4669_s3, %s3864_s29  ;;  %p3868_p3 = scmp.lt.u32.totalorder %s3864_s29, %s4669_s3 }
  0x29   :  { %p3870_p4 = pnand %p3868_p3, %p3865_p2 }
  0x2b   :  { %3873 = shalt.err (!%p3870_p4)
}
  0x2c   :  { %s3874_s0 = scalar_lea.vmem %s47_s23, 1024  ;;  %p3879_p6 = scmp.lt.s32.totalorder %s47_s23, %s47_s23 }
  0x2d   :  { %p3875_p5 = scmp.ne.s32.totalorder %s47_s23, %s3874_s0  ;;  %p3880_p7 = scmp.lt.s32.totalorder %s3874_s0, %s3874_s0 }
  0x2f   :  { %p3881_p8 = por %p3880_p7, %p3879_p6 }
  0x31   :  { %p3882_p9 = pnand %p3881_p8, %p3875_p5 }
  0x33   :  { %3885 = shalt.err (!%p3882_p9)
}
  0x34   :  { %52 = dma.hbm_to_vmem [thread:$0]  %s4669_s3, 1024, %s47_s23, [#allocation6], %s3940_s9, %s3940_s9, %s3941_s10  }
  0x35   :  { %s3886_s15 = scalar_lea.hbm %s4671_s5, 9216 }
  0x36   :  { %p3887_p10 = scmp.ne.s32.totalorder %s4671_s5, %s3886_s15  ;;  %p3890_p11 = scmp.lt.u32.totalorder %s3886_s15, %s4671_s5 }
  0x38   :  { %p3892_p12 = pnand %p3890_p11, %p3887_p10 }
  0x3a   :  { %3895 = shalt.err (!%p3892_p12)
}
  0x3b   :  { %s3896_s20 = scalar_lea.vmem %s4022_s26, 9216  ;;  %p3901_p0 = scmp.lt.s32.totalorder %s4022_s26, %s4022_s26 }
  0x3c   :  { %p3897_p13 = scmp.ne.s32.totalorder %s4022_s26, %s3896_s20  ;;  %p3902_p1 = scmp.lt.s32.totalorder %s3896_s20, %s3896_s20 }
  0x3e   :  { %p3903_p2 = por %p3902_p1, %p3901_p0 }
  0x40   :  { %p3904_p3 = pnand %p3903_p2, %p3897_p13 }
  0x42   :  { %3907 = shalt.err (!%p3904_p3)
}
  0x43   :  { %s3944_s3 = smov 192   ;;  %s3945_s9 = smov 12  }
  0x44   :  { %66 = dma.hbm_to_vmem [thread:$0]  %s4671_s5, 9216, %s4022_s26, [#allocation9], %s3944_s3, %s3944_s3, %s3945_s9  }
  0x45   :  { %3930 = dma.done.wait [#allocation3], 3072  }
  0x46   :  { %3931 = vsyncadd [#allocation3], 4294964224 }
  0x47   :  { %3932 = dma.done.wait [#allocation6], 2048  }
  0x48   :  { %3933 = vsyncadd [#allocation6], 4294965248 }
  0x49   :  { %3934 = dma.done.wait [#allocation9], 9216  }
  0x4a   :  { %3935 = vsyncadd [#allocation9], 4294958080  ;;  %v3421_v0 = vld [vmem:[#allocation5] sm:$0xff]   ;;  %v3422_v1 = vld [vmem:[#allocation5 + $0x8] sm:$0xff]   ;;  %v3946_v32 = vmov 0  }
  0x4b   :  { %3153 = vmatprep.subr.bf16.mxu0 %v3421_v0  ;;  %v3423_v2 = vld [vmem:[#allocation5 + $0x10] sm:$0xff]   ;;  %v3424_v3 = vld [vmem:[#allocation5 + $0x18] sm:$0xff]   ;;  %v3429_v4 = vld [vmem:[#allocation2] sm:$0xff]   ;;  %1072 = vmatprep.subr.bf16.mxu1 %v3946_v32 }
  0x4c   :  { %3154 = vmatpush3.bf16.msra.mxu0 %v3421_v0  ;;  %3169 = vmatprep.mubr.bf16.mxu0 %v3429_v4  ;;  %v3425_v5 = vld [vmem:[#allocation5 + $0x20] sm:$0xff]   ;;  %v3426_v6 = vld [vmem:[#allocation5 + $0x28] sm:$0xff]   ;;  %v3427_v7 = vld [vmem:[#allocation5 + $0x30] sm:$0xff]  }
  0x4d   :  { %3155 = vmatprep.subr.bf16.mxu0 %v3422_v1  ;;  %v3428_v8 = vld [vmem:[#allocation5 + $0x38] sm:$0xff]   ;;  %v3430_v9 = vld [vmem:[#allocation2 + $0x8] sm:$0xff]   ;;  %v3431_v10 = vld [vmem:[#allocation2 + $0x10] sm:$0xff]  }
  0x4e   :  { %v3432_v11 = vld [vmem:[#allocation2 + $0x18] sm:$0xff]   ;;  %v3433_v12 = vld [vmem:[#allocation2 + $0x20] sm:$0xff]   ;;  %v3434_v13 = vld [vmem:[#allocation2 + $0x28] sm:$0xff]  }
  0x4f   :  { %v3435_v14 = vld [vmem:[#allocation2 + $0x30] sm:$0xff]   ;;  %v3436_v15 = vld [vmem:[#allocation2 + $0x38] sm:$0xff]   ;;  %v3437_v16 = vld [vmem:[#allocation2 + $0x40] sm:$0xff]  }
  0x50   :  { %3156 = vmatpush3.bf16.msra.mxu0 %v3422_v1  ;;  %v3438_v17 = vld [vmem:[#allocation2 + $0x48] sm:$0xff]   ;;  %v3439_v18 = vld [vmem:[#allocation2 + $0x50] sm:$0xff]   ;;  %v3440_v19 = vld [vmem:[#allocation2 + $0x58] sm:$0xff]  }
  0x51   :  { %3157 = vmatprep.subr.bf16.mxu0 %v3423_v2  ;;  %v3441_v20 = vld [vmem:[#allocation2 + $0x60] sm:$0xff]   ;;  %v3442_v21 = vld [vmem:[#allocation2 + $0x68] sm:$0xff]   ;;  %v3443_v22 = vld [vmem:[#allocation2 + $0x70] sm:$0xff]  }
  0x52   :  { %v3444_v23 = vld [vmem:[#allocation2 + $0x78] sm:$0xff]   ;;  %v3445_v24 = vld [vmem:[#allocation2 + $0x80] sm:$0xff]   ;;  %v3446_v25 = vld [vmem:[#allocation2 + $0x88] sm:$0xff]  }
  0x53   :  { %v3447_v26 = vld [vmem:[#allocation2 + $0x90] sm:$0xff]   ;;  %v3448_v27 = vld [vmem:[#allocation2 + $0x98] sm:$0xff]   ;;  %v3449_v28 = vld [vmem:[#allocation2 + $0xa0] sm:$0xff]  }
  0x54   :  { %3158 = vmatpush3.bf16.msra.mxu0 %v3423_v2  ;;  %v3450_v29 = vld [vmem:[#allocation2 + $0xa8] sm:$0xff]   ;;  %v3451_v30 = vld [vmem:[#allocation2 + $0xb0] sm:$0xff]   ;;  %v3452_v31 = vld [vmem:[#allocation2 + $0xb8] sm:$0xff]  }
  0x55   :  { %3159 = vmatprep.subr.bf16.mxu0 %v3424_v3  ;;  %v4057_v33 = vld [vmem:[#allocation8 + $0x4] ss:$12 sps:$4 sm:$0xff]   ;;  %v3468_v34 = vld [vmem:[#allocation8 + $0x8] ss:$12 sps:$4 sm:$0xff]  }
  0x56   :  { %1104 = vmatprep.mubr.bf16.mxu1 %v4057_v33 }
  0x58   :  { %3160 = vmatpush3.bf16.msra.mxu0 %v3424_v3 }
  0x59   :  { %3161 = vmatprep.subr.bf16.mxu0 %v3425_v5 }
  0x5c   :  { %3162 = vmatpush3.bf16.msra.mxu0 %v3425_v5 }
  0x5d   :  { %3163 = vmatprep.subr.bf16.mxu0 %v3426_v6 }
  0x60   :  { %3164 = vmatpush3.bf16.msra.mxu0 %v3426_v6 }
  0x61   :  { %3165 = vmatprep.subr.bf16.mxu0 %v3427_v7 }
  0x64   :  { %3166 = vmatpush3.bf16.msra.mxu0 %v3427_v7 }
  0x65   :  { %3167 = vmatprep.subr.bf16.mxu0 %v3428_v8 }
  0x68   :  { %3168 = vmatpush3.bf16.msra.mxu0 %v3428_v8 }
  0x6b   :  { %3170 = vmatmul.mubr.bf16.vlgmr.msra.gmra.mrb[0].mxu0 %v3430_v9 }
  0x6c   :  { %3173 = vmatprep.mubr.bf16.mxu0 %v3431_v10 }
  0x73   :  { %3174 = vmatmul.mubr.bf16.gmra.mrb[4].mxu0 %v3432_v11 }
  0x74   :  { %3177 = vmatprep.mubr.bf16.mxu0 %v3433_v12 }
  0x7b   :  { %3178 = vmatmul.mubr.bf16.gmra.mrb[8].mxu0 %v3434_v13 }
  0x7c   :  { %3181 = vmatprep.mubr.bf16.mxu0 %v3435_v14 }
  0x83   :  { %3182 = vmatmul.mubr.bf16.gmra.mrb[12].mxu0 %v3436_v15 }
  0x84   :  { %3185 = vmatprep.mubr.bf16.mxu0 %v3437_v16 }
  0x8b   :  { %3186 = vmatmul.mubr.bf16.gmra.mrb[16].mxu0 %v3438_v17 }
  0x8c   :  { %3189 = vmatprep.mubr.bf16.mxu0 %v3439_v18 }
  0x93   :  { %3190 = vmatmul.mubr.bf16.gmra.mrb[20].mxu0 %v3440_v19 }
  0x94   :  { %3193 = vmatprep.mubr.bf16.mxu0 %v3441_v20 }
  0x9b   :  { %3194 = vmatmul.mubr.bf16.gmra.mrb[24].mxu0 %v3442_v21  ;;  %v3453_v21 = vld [vmem:[#allocation8] ss:$12 sps:$4 sm:$0xff]  }
  0x9c   :  { %3197 = vmatprep.mubr.bf16.mxu0 %v3443_v22 }
  0xa3   :  { %3198 = vmatmul.mubr.bf16.gmra.mrb[28].mxu0 %v3444_v23  ;;  %v3456_v23 = vld [vmem:[#allocation8 + $0x1c] ss:$12 sps:$4 sm:$0xff]  }
  0xa4   :  { %3201 = vmatprep.mubr.bf16.mxu0 %v3445_v24 }
  0xab   :  { %3202 = vmatmul.mubr.bf16.gmra.mrb[32].mxu0 %v3446_v25 }
  0xac   :  { %3205 = vmatprep.mubr.bf16.mxu0 %v3447_v26 }
  0xb3   :  { %3206 = vmatmul.mubr.bf16.gmra.mrb[36].mxu0 %v3448_v27 }
  0xb4   :  { %3209 = vmatprep.mubr.bf16.mxu0 %v3449_v28 }
  0xbb   :  { %3210 = vmatmul.mubr.bf16.gmra.mrb[40].mxu0 %v3450_v29  ;;  %v3458_v29 = vld [vmem:[#allocation8 + $0x18] ss:$12 sps:$4 sm:$0xff]  }
  0xbc   :  { %3213 = vmatprep.mubr.bf16.mxu0 %v3451_v30 }
  0xc3   :  { %3214 = vmatmul.mubr.bf16.gmra.mrb[44].mxu0 %v3452_v31  ;;  %v3459_v31 = vld [vmem:[#allocation8 + $0x34] ss:$12 sps:$4 sm:$0xff]  }
  0xc4   :  { %3233 = vmatprep.mubr.bf16.mxu0 %v3468_v34 }
 0x13e   :  { %v3171_v35 = vpop.f32.mrb[0].mxu0 }
 0x13f   :  { %v466_v36 = vpop.f32.mrb[1].mxu0 }
 0x140   :  { %v3172_v37 = vpop.f32.mrb[2].mxu0 }
 0x141   :  { %v658_v38 = vpack.c.bf16 %v3172_v37, %v3171_v35  ;;  %v469_v39 = vpop.f32.mrb[3].mxu0 }
 0x142   :  { %v657_v40 = vpack.c.bf16 %v469_v39, %v466_v36  ;;  %v3461_v39 = vld [vmem:[#allocation8 + $0x30] ss:$12 sps:$4 sm:$0xff]  }
 0x144   :  { %1073 = vmatpush1.bf16.msra.mxu1 %v657_v40 }
 0x145   :  { %1074 = vmatprep.subr.bf16.mxu1 %v3946_v32 }
 0x146   :  { %v3175_v41 = vpop.f32.mrb[4].mxu0 }
 0x147   :  { %v482_v42 = vpop.f32.mrb[5].mxu0 }
 0x148   :  { %v3176_v43 = vpop.f32.mrb[6].mxu0  ;;  %1075 = vmatpush1.bf16.msra.mxu1 %v658_v38 }
 0x149   :  { %v660_v44 = vpack.c.bf16 %v3176_v43, %v3175_v41  ;;  %v485_v45 = vpop.f32.mrb[7].mxu0  ;;  %1076 = vmatprep.subr.bf16.mxu1 %v3946_v32  ;;  %v3462_v41 = vld [vmem:[#allocation8 + $0x4c] ss:$12 sps:$4 sm:$0xff]  }
 0x14a   :  { %v659_v46 = vpack.c.bf16 %v485_v45, %v482_v42 }
 0x14c   :  { %1077 = vmatpush1.bf16.msra.mxu1 %v659_v46 }
 0x14d   :  { %1078 = vmatprep.subr.bf16.mxu1 %v3946_v32 }
 0x14e   :  { %v3179_v47 = vpop.f32.mrb[8].mxu0 }
 0x14f   :  { %v498_v48 = vpop.f32.mrb[9].mxu0 }
 0x150   :  { %v3180_v49 = vpop.f32.mrb[10].mxu0  ;;  %1079 = vmatpush1.bf16.msra.mxu1 %v660_v44 }
 0x151   :  { %v662_v50 = vpack.c.bf16 %v3180_v49, %v3179_v47  ;;  %v501_v51 = vpop.f32.mrb[11].mxu0  ;;  %1080 = vmatprep.subr.bf16.mxu1 %v3946_v32  ;;  %v3464_v47 = vld [vmem:[#allocation8 + $0x48] ss:$12 sps:$4 sm:$0xff]   ;;  %v3465_v49 = vld [vmem:[#allocation8 + $0x64] ss:$12 sps:$4 sm:$0xff]  }
 0x152   :  { %v661_v52 = vpack.c.bf16 %v501_v51, %v498_v48 }
 0x154   :  { %1081 = vmatpush1.bf16.msra.mxu1 %v661_v52 }
 0x155   :  { %1082 = vmatprep.subr.bf16.mxu1 %v3946_v32 }
 0x156   :  { %v3183_v53 = vpop.f32.mrb[12].mxu0 }
 0x157   :  { %v514_v54 = vpop.f32.mrb[13].mxu0 }
 0x158   :  { %v3184_v55 = vpop.f32.mrb[14].mxu0  ;;  %1083 = vmatpush1.bf16.msra.mxu1 %v662_v50 }
 0x159   :  { %v664_v56 = vpack.c.bf16 %v3184_v55, %v3183_v53  ;;  %v517_v57 = vpop.f32.mrb[15].mxu0  ;;  %1084 = vmatprep.subr.bf16.mxu1 %v3946_v32  ;;  %v3467_v53 = vld [vmem:[#allocation8 + $0x60] ss:$12 sps:$4 sm:$0xff]   ;;  %v3470_v55 = vld [vmem:[#allocation8 + $0x7c] ss:$12 sps:$4 sm:$0xff]  }
 0x15a   :  { %v663_v58 = vpack.c.bf16 %v517_v57, %v514_v54  ;;  %v3469_v54 = vld [vmem:[#allocation8 + $0x20] ss:$12 sps:$4 sm:$0xff]   ;;  %v3472_v57 = vld [vmem:[#allocation8 + $0x78] ss:$12 sps:$4 sm:$0xff]  }
 0x15c   :  { %1085 = vmatpush1.bf16.msra.mxu1 %v663_v58  ;;  %v3474_v58 = vld [vmem:[#allocation8 + $0x50] ss:$12 sps:$4 sm:$0xff]  }
 0x15d   :  { %1086 = vmatprep.subr.bf16.mxu1 %v3946_v32 }
 0x15e   :  { %v3187_v59 = vpop.f32.mrb[16].mxu0 }
 0x15f   :  { %v530_v60 = vpop.f32.mrb[17].mxu0 }
 0x160   :  { %v3188_v61 = vpop.f32.mrb[18].mxu0  ;;  %1087 = vmatpush1.bf16.msra.mxu1 %v664_v56  ;;  %v3473_v56 = vld [vmem:[#allocation8 + $0x38] ss:$12 sps:$4 sm:$0xff]  }
 0x161   :  { %v666_v62 = vpack.c.bf16 %v3188_v61, %v3187_v59  ;;  %v533_v63 = vpop.f32.mrb[19].mxu0  ;;  %1088 = vmatprep.subr.bf16.mxu1 %v3946_v32  ;;  %v3475_v59 = vld [vmem:[#allocation8 + $0x94] ss:$12 sps:$4 sm:$0xff]   ;;  %v3477_v61 = vld [vmem:[#allocation8 + $0x90] ss:$12 sps:$4 sm:$0xff]  }
 0x162   :  { %v665_v0 = vpack.c.bf16 %v533_v63, %v530_v60  ;;  %v3484_v60 = vld [vmem:[#allocation8 + $0x68] ss:$12 sps:$4 sm:$0xff]   ;;  %v3485_v63 = vld [vmem:[#allocation8 + $0x80] ss:$12 sps:$4 sm:$0xff]  }
 0x164   :  { %1089 = vmatpush1.bf16.msra.mxu1 %v665_v0  ;;  %v3494_v0 = vld [vmem:[#allocation8 + $0x98] ss:$12 sps:$4 sm:$0xff]  }
 0x165   :  { %1090 = vmatprep.subr.bf16.mxu1 %v3946_v32 }
 0x166   :  { %v3191_v1 = vpop.f32.mrb[20].mxu0 }
 0x167   :  { %v546_v2 = vpop.f32.mrb[21].mxu0 }
 0x168   :  { %v3192_v3 = vpop.f32.mrb[22].mxu0  ;;  %1091 = vmatpush1.bf16.msra.mxu1 %v666_v62  ;;  %v3478_v62 = vld [vmem:[#allocation8 + $0xac] ss:$12 sps:$4 sm:$0xff]  }
 0x169   :  { %v668_v4 = vpack.c.bf16 %v3192_v3, %v3191_v1  ;;  %v549_v5 = vpop.f32.mrb[23].mxu0  ;;  %1092 = vmatprep.subr.bf16.mxu1 %v3946_v32  ;;  %v3480_v1 = vld [vmem:[#allocation8 + $0xa8] ss:$12 sps:$4 sm:$0xff]   ;;  %v3496_v3 = vld [vmem:[#allocation8 + $0xb0] ss:$12 sps:$4 sm:$0xff]  }
 0x16a   :  { %v667_v6 = vpack.c.bf16 %v549_v5, %v546_v2  ;;  %v3481_v2 = vld [vmem:[#allocation8 + $0xc4] ss:$12 sps:$4 sm:$0xff]  }
 0x16b   :  { %v3549_v5 = vld [vmem:[#allocation7] sm:$0xff]  }
 0x16c   :  { %1093 = vmatpush1.bf16.msra.mxu1 %v667_v6  ;;  %v3550_v6 = vld [vmem:[#allocation7 + $0x8] sm:$0xff]  }
 0x16d   :  { %1094 = vmatprep.subr.bf16.mxu1 %v3946_v32 }
 0x16e   :  { %v3195_v7 = vpop.f32.mrb[24].mxu0 }
 0x16f   :  { %v562_v8 = vpop.f32.mrb[25].mxu0 }
 0x170   :  { %v3196_v9 = vpop.f32.mrb[26].mxu0  ;;  %1095 = vmatpush1.bf16.msra.mxu1 %v668_v4  ;;  %v3499_v4 = vld [vmem:[#allocation8 + $0xc8] ss:$12 sps:$4 sm:$0xff]  }
 0x171   :  { %v670_v10 = vpack.c.bf16 %v3196_v9, %v3195_v7  ;;  %v565_v11 = vpop.f32.mrb[27].mxu0  ;;  %1096 = vmatprep.subr.bf16.mxu1 %v3946_v32  ;;  %v3483_v7 = vld [vmem:[#allocation8 + $0xc0] ss:$12 sps:$4 sm:$0xff]   ;;  %v3486_v9 = vld [vmem:[#allocation8 + $0xdc] ss:$12 sps:$4 sm:$0xff]  }
 0x172   :  { %v669_v12 = vpack.c.bf16 %v565_v11, %v562_v8  ;;  %v3551_v8 = vld [vmem:[#allocation7 + $0x10] sm:$0xff]   ;;  %v3504_v11 = vld [vmem:[#allocation8 + $0xf8] ss:$12 sps:$4 sm:$0xff]  }
 0x174   :  { %1097 = vmatpush1.bf16.msra.mxu1 %v669_v12  ;;  %v3488_v12 = vld [vmem:[#allocation8 + $0xd8] ss:$12 sps:$4 sm:$0xff]  }
 0x175   :  { %1098 = vmatprep.subr.bf16.mxu1 %v3946_v32 }
 0x176   :  { %v3199_v13 = vpop.f32.mrb[28].mxu0 }
 0x177   :  { %v578_v14 = vpop.f32.mrb[29].mxu0 }
 0x178   :  { %v3200_v15 = vpop.f32.mrb[30].mxu0  ;;  %1099 = vmatpush1.bf16.msra.mxu1 %v670_v10  ;;  %v3501_v10 = vld [vmem:[#allocation8 + $0xe0] ss:$12 sps:$4 sm:$0xff]  }
 0x179   :  { %v672_v16 = vpack.c.bf16 %v3200_v15, %v3199_v13  ;;  %v581_v17 = vpop.f32.mrb[31].mxu0  ;;  %1100 = vmatprep.subr.bf16.mxu1 %v3946_v32  ;;  %v3489_v13 = vld [vmem:[#allocation8 + $0xf4] ss:$12 sps:$4 sm:$0xff]  }
 0x17a   :  { %v671_v18 = vpack.c.bf16 %v581_v17, %v578_v14  ;;  %v3506_v14 = vld [vmem:[#allocation8 + $0x110] ss:$12 sps:$4 sm:$0xff]   ;;  %v3509_v15 = vld [vmem:[#allocation8 + $0x128] ss:$12 sps:$4 sm:$0xff]   ;;  %v3492_v17 = vld [vmem:[#allocation8 + $0x10c] ss:$12 sps:$4 sm:$0xff]  }
 0x17c   :  { %1101 = vmatpush1.bf16.msra.mxu1 %v671_v18  ;;  %v3511_v18 = vld [vmem:[#allocation8 + $0x140] ss:$12 sps:$4 sm:$0xff]  }
 0x17d   :  { %1102 = vmatprep.subr.bf16.mxu1 %v3946_v32 }
 0x17e   :  { %v3203_v19 = vpop.f32.mrb[32].mxu0 }
 0x17f   :  { %v594_v20 = vpop.f32.mrb[33].mxu0 }
 0x180   :  { %v3204_v22 = vpop.f32.mrb[34].mxu0  ;;  %1103 = vmatpush1.bf16.msra.mxu1 %v672_v16  ;;  %v3491_v16 = vld [vmem:[#allocation8 + $0xf0] ss:$12 sps:$4 sm:$0xff]  }
 0x181   :  { %v674_v24 = vpack.c.bf16 %v3204_v22, %v3203_v19  ;;  %v597_v25 = vpop.f32.mrb[35].mxu0  ;;  %1914 = vmatprep.subr.bf16.mxu1 %v3946_v32  ;;  %v3514_v19 = vld [vmem:[#allocation8 + $0x158] ss:$12 sps:$4 sm:$0xff]   ;;  %v3516_v22 = vld [vmem:[#allocation8 + $0x170] ss:$12 sps:$4 sm:$0xff]  }
 0x182   :  { %v673_v26 = vpack.c.bf16 %v597_v25, %v594_v20  ;;  %v3495_v20 = vld [vmem:[#allocation8 + $0x108] ss:$12 sps:$4 sm:$0xff]   ;;  %v3553_v25 = vld [vmem:[#allocation7 + $0x20] sm:$0xff]  }
 0x183   :  { %1105 = vmatmul.mubr.bf16.vlgmr.msra.gmra.mrb[0].mxu1 %v3453_v21  ;;  %v3497_v21 = vld [vmem:[#allocation8 + $0x124] ss:$12 sps:$4 sm:$0xff]  }
 0x184   :  { %3217 = vmatprep.subr.bf16.mxu0 %v673_v26  ;;  %1112 = vmatprep.mubr.bf16.mxu1 %v3456_v23  ;;  %v3531_v23 = vld [vmem:[#allocation8 + $0x188] ss:$12 sps:$4 sm:$0xff]  }
 0x185   :  { %3218 = vmatpush3.bf16.msra.mxu0 %v673_v26  ;;  %v3500_v26 = vld [vmem:[#allocation8 + $0x120] ss:$12 sps:$4 sm:$0xff]  }
 0x186   :  { %v3207_v27 = vpop.f32.mrb[36].mxu0  ;;  %3219 = vmatprep.subr.bf16.mxu0 %v674_v24 }
 0x187   :  { %v610_v28 = vpop.f32.mrb[37].mxu0 }
 0x188   :  { %v3208_v30 = vpop.f32.mrb[38].mxu0 }
 0x189   :  { %v676_v34 = vpack.c.bf16 %v3208_v30, %v3207_v27  ;;  %v613_v35 = vpop.f32.mrb[39].mxu0  ;;  %3220 = vmatpush3.bf16.msra.mxu0 %v674_v24  ;;  %v3552_v24 = vld [vmem:[#allocation7 + $0x18] sm:$0xff]   ;;  %v3554_v30 = vld [vmem:[#allocation7 + $0x28] sm:$0xff]  }
 0x18a   :  { %v675_v36 = vpack.c.bf16 %v613_v35, %v610_v28  ;;  %v3502_v27 = vld [vmem:[#allocation8 + $0x13c] ss:$12 sps:$4 sm:$0xff]   ;;  %v3533_v28 = vld [vmem:[#allocation8 + $0x1a0] ss:$12 sps:$4 sm:$0xff]  }
 0x18b   :  { %1113 = vmatmul.mubr.bf16.gmra.mrb[4].mxu1 %v3458_v29  ;;  %v3536_v29 = vld [vmem:[#allocation8 + $0x1b8] ss:$12 sps:$4 sm:$0xff]   ;;  %v3538_v35 = vld [vmem:[#allocation8 + $0x1d0] ss:$12 sps:$4 sm:$0xff]  }
 0x18c   :  { %3221 = vmatprep.subr.bf16.mxu0 %v675_v36  ;;  %1120 = vmatprep.mubr.bf16.mxu1 %v3459_v31  ;;  %v3505_v31 = vld [vmem:[#allocation8 + $0x138] ss:$12 sps:$4 sm:$0xff]  }
 0x18d   :  { %3222 = vmatpush3.bf16.msra.mxu0 %v675_v36  ;;  %v3541_v36 = vld [vmem:[#allocation8 + $0x1e8] ss:$12 sps:$4 sm:$0xff]  }
 0x18e   :  { %v3211_v37 = vpop.f32.mrb[40].mxu0  ;;  %3223 = vmatprep.subr.bf16.mxu0 %v676_v34 }
 0x18f   :  { %v626_v38 = vpop.f32.mrb[41].mxu0 }
 0x190   :  { %v3212_v40 = vpop.f32.mrb[42].mxu0 }
 0x191   :  { %v678_v42 = vpack.c.bf16 %v3212_v40, %v3211_v37  ;;  %v629_v43 = vpop.f32.mrb[43].mxu0  ;;  %3224 = vmatpush3.bf16.msra.mxu0 %v676_v34  ;;  %v3507_v34 = vld [vmem:[#allocation8 + $0x154] ss:$12 sps:$4 sm:$0xff]   ;;  %v3510_v37 = vld [vmem:[#allocation8 + $0x150] ss:$12 sps:$4 sm:$0xff]  }
 0x192   :  { %v677_v44 = vpack.c.bf16 %v629_v43, %v626_v38  ;;  %v3512_v38 = vld [vmem:[#allocation8 + $0x16c] ss:$12 sps:$4 sm:$0xff]   ;;  %v3548_v43 = vld [vmem:[#allocation8 + $0x230] ss:$12 sps:$4 sm:$0xff]  }
 0x193   :  { %1121 = vmatmul.mubr.bf16.gmra.mrb[8].mxu1 %v3461_v39  ;;  %v3543_v39 = vld [vmem:[#allocation8 + $0x200] ss:$12 sps:$4 sm:$0xff]   ;;  %v3546_v40 = vld [vmem:[#allocation8 + $0x218] ss:$12 sps:$4 sm:$0xff]  }
 0x194   :  { %3225 = vmatprep.subr.bf16.mxu0 %v677_v44  ;;  %1128 = vmatprep.mubr.bf16.mxu1 %v3462_v41  ;;  %v3515_v41 = vld [vmem:[#allocation8 + $0x168] ss:$12 sps:$4 sm:$0xff]  }
 0x195   :  { %3226 = vmatpush3.bf16.msra.mxu0 %v677_v44  ;;  %v3555_v44 = vld [vmem:[#allocation7 + $0x30] sm:$0xff]  }
 0x196   :  { %v3215_v45 = vpop.f32.mrb[44].mxu0  ;;  %3227 = vmatprep.subr.bf16.mxu0 %v678_v42 }
 0x197   :  { %v642_v46 = vpop.f32.mrb[45].mxu0 }
 0x198   :  { %v3216_v48 = vpop.f32.mrb[46].mxu0 }
 0x199   :  { %v680_v50 = vpack.c.bf16 %v3216_v48, %v3215_v45  ;;  %v645_v51 = vpop.f32.mrb[47].mxu0  ;;  %3228 = vmatpush3.bf16.msra.mxu0 %v678_v42  ;;  %v3517_v42 = vld [vmem:[#allocation8 + $0x184] ss:$12 sps:$4 sm:$0xff]   ;;  %v3556_v45 = vld [vmem:[#allocation7 + $0x38] sm:$0xff]  }
 0x19a   :  { %v679_v52 = vpack.c.bf16 %v645_v51, %v642_v46  ;;  %v3519_v46 = vld [vmem:[#allocation8 + $0x180] ss:$12 sps:$4 sm:$0xff]   ;;  %v3522_v48 = vld [vmem:[#allocation8 + $0x198] ss:$12 sps:$4 sm:$0xff]  }
 0x19b   :  { %1129 = vmatmul.mubr.bf16.gmra.mrb[12].mxu1 %v3464_v47  ;;  %v3520_v47 = vld [vmem:[#allocation8 + $0x19c] ss:$12 sps:$4 sm:$0xff]   ;;  %v3526_v51 = vld [vmem:[#allocation8 + $0x1cc] ss:$12 sps:$4 sm:$0xff]  }
 0x19c   :  { %3229 = vmatprep.subr.bf16.mxu0 %v679_v52  ;;  %1136 = vmatprep.mubr.bf16.mxu1 %v3465_v49  ;;  %v3523_v49 = vld [vmem:[#allocation8 + $0x1b4] ss:$12 sps:$4 sm:$0xff]  }
 0x19d   :  { %3230 = vmatpush3.bf16.msra.mxu0 %v679_v52  ;;  %v3528_v52 = vld [vmem:[#allocation8 + $0x1c8] ss:$12 sps:$4 sm:$0xff]  }
 0x19e   :  { %3231 = vmatprep.subr.bf16.mxu0 %v680_v50 }
 0x1a1   :  { %3232 = vmatpush3.bf16.msra.mxu0 %v680_v50  ;;  %v3525_v50 = vld [vmem:[#allocation8 + $0x1b0] ss:$12 sps:$4 sm:$0xff]  }
 0x1a2   :  { %3281 = vmatprep.subr.bf16.mxu0 %v3549_v5 }
 0x1a3   :  { %1137 = vmatmul.mubr.bf16.gmra.mrb[16].mxu1 %v3467_v53  ;;  %v3529_v53 = vld [vmem:[#allocation8 + $0x1e4] ss:$12 sps:$4 sm:$0xff]  }
 0x1a4   :  { %3234 = vmatmul.mubr.bf16.vlgmr.msra.gmra.mrb[48].mxu0 %v3469_v54  ;;  %1144 = vmatprep.mubr.bf16.mxu1 %v3470_v55  ;;  %v3532_v54 = vld [vmem:[#allocation8 + $0x1e0] ss:$12 sps:$4 sm:$0xff]   ;;  %v3534_v55 = vld [vmem:[#allocation8 + $0x1fc] ss:$12 sps:$4 sm:$0xff]  }
 0x1a5   :  { %3237 = vmatprep.mubr.bf16.mxu0 %v3473_v56  ;;  %3282 = vmatpush3.bf16.msra.mxu0 %v3549_v5  ;;  %v3537_v56 = vld [vmem:[#allocation8 + $0x1f8] ss:$12 sps:$4 sm:$0xff]  }
 0x1a6   :  { %3283 = vmatprep.subr.bf16.mxu0 %v3550_v6 }
 0x1a9   :  { %3284 = vmatpush3.bf16.msra.mxu0 %v3550_v6 }
 0x1aa   :  { %3285 = vmatprep.subr.bf16.mxu0 %v3551_v8 }
 0x1ab   :  { %1145 = vmatmul.mubr.bf16.gmra.mrb[20].mxu1 %v3472_v57  ;;  %v3539_v57 = vld [vmem:[#allocation8 + $0x214] ss:$12 sps:$4 sm:$0xff]  }
 0x1ac   :  { %3238 = vmatmul.mubr.bf16.gmra.mrb[52].mxu0 %v3474_v58  ;;  %1152 = vmatprep.mubr.bf16.mxu1 %v3475_v59  ;;  %v3542_v58 = vld [vmem:[#allocation8 + $0x210] ss:$12 sps:$4 sm:$0xff]   ;;  %v3544_v59 = vld [vmem:[#allocation8 + $0x22c] ss:$12 sps:$4 sm:$0xff]  }
 0x1ad   :  { %3241 = vmatprep.mubr.bf16.mxu0 %v3484_v60  ;;  %3286 = vmatpush3.bf16.msra.mxu0 %v3551_v8  ;;  %v3547_v60 = vld [vmem:[#allocation8 + $0x228] ss:$12 sps:$4 sm:$0xff]  }
 0x1ae   :  { %3287 = vmatprep.subr.bf16.mxu0 %v3552_v24 }
 0x1b1   :  { %3288 = vmatpush3.bf16.msra.mxu0 %v3552_v24 }
 0x1b2   :  { %3289 = vmatprep.subr.bf16.mxu0 %v3553_v25 }
 0x1b3   :  { %1153 = vmatmul.mubr.bf16.gmra.mrb[24].mxu1 %v3477_v61 }
 0x1b4   :  { %1160 = vmatprep.mubr.bf16.mxu1 %v3478_v62  ;;  %3242 = vmatmul.mubr.bf16.gmra.mrb[56].mxu0 %v3485_v63 }
 0x1b5   :  { %3245 = vmatprep.mubr.bf16.mxu0 %v3494_v0  ;;  %3290 = vmatpush3.bf16.msra.mxu0 %v3553_v25 }
 0x1b6   :  { %3291 = vmatprep.subr.bf16.mxu0 %v3554_v30 }
 0x1b9   :  { %3292 = vmatpush3.bf16.msra.mxu0 %v3554_v30 }
 0x1ba   :  { %3293 = vmatprep.subr.bf16.mxu0 %v3555_v44 }
 0x1bb   :  { %1161 = vmatmul.mubr.bf16.gmra.mrb[28].mxu1 %v3480_v1 }
 0x1bc   :  { %1168 = vmatprep.mubr.bf16.mxu1 %v3481_v2  ;;  %3246 = vmatmul.mubr.bf16.gmra.mrb[60].mxu0 %v3496_v3 }
 0x1bd   :  { %3249 = vmatprep.mubr.bf16.mxu0 %v3499_v4  ;;  %3294 = vmatpush3.bf16.msra.mxu0 %v3555_v44 }
 0x1be   :  { %3295 = vmatprep.subr.bf16.mxu0 %v3556_v45 }
 0x1c1   :  { %3296 = vmatpush3.bf16.msra.mxu0 %v3556_v45 }
 0x1c3   :  { %1169 = vmatmul.mubr.bf16.gmra.mrb[32].mxu1 %v3483_v7 }
 0x1c4   :  { %1176 = vmatprep.mubr.bf16.mxu1 %v3486_v9  ;;  %3250 = vmatmul.mubr.bf16.gmra.mrb[64].mxu0 %v3501_v10 }
 0x1c5   :  { %3253 = vmatprep.mubr.bf16.mxu0 %v3504_v11 }
 0x1cb   :  { %1177 = vmatmul.mubr.bf16.gmra.mrb[36].mxu1 %v3488_v12 }
 0x1cc   :  { %1184 = vmatprep.mubr.bf16.mxu1 %v3489_v13  ;;  %3254 = vmatmul.mubr.bf16.gmra.mrb[68].mxu0 %v3506_v14 }
 0x1cd   :  { %3257 = vmatprep.mubr.bf16.mxu0 %v3509_v15 }
 0x1d3   :  { %1185 = vmatmul.mubr.bf16.gmra.mrb[40].mxu1 %v3491_v16 }
 0x1d4   :  { %1192 = vmatprep.mubr.bf16.mxu1 %v3492_v17  ;;  %3258 = vmatmul.mubr.bf16.gmra.mrb[72].mxu0 %v3511_v18 }
 0x1d5   :  { %3261 = vmatprep.mubr.bf16.mxu0 %v3514_v19 }
 0x1db   :  { %1193 = vmatmul.mubr.bf16.gmra.mrb[44].mxu1 %v3495_v20 }
 0x1dc   :  { %1200 = vmatprep.mubr.bf16.mxu1 %v3497_v21  ;;  %3262 = vmatmul.mubr.bf16.gmra.mrb[76].mxu0 %v3516_v22 }
 0x1dd   :  { %3265 = vmatprep.mubr.bf16.mxu0 %v3531_v23 }
 0x1e3   :  { %1201 = vmatmul.mubr.bf16.gmra.mrb[48].mxu1 %v3500_v26 }
 0x1e4   :  { %1208 = vmatprep.mubr.bf16.mxu1 %v3502_v27  ;;  %3266 = vmatmul.mubr.bf16.gmra.mrb[80].mxu0 %v3533_v28 }
 0x1e5   :  { %3269 = vmatprep.mubr.bf16.mxu0 %v3536_v29 }
 0x1eb   :  { %1209 = vmatmul.mubr.bf16.gmra.mrb[52].mxu1 %v3505_v31 }
 0x1ec   :  { %1216 = vmatprep.mubr.bf16.mxu1 %v3507_v34  ;;  %3270 = vmatmul.mubr.bf16.gmra.mrb[84].mxu0 %v3538_v35 }
 0x1ed   :  { %3273 = vmatprep.mubr.bf16.mxu0 %v3541_v36 }
 0x1f3   :  { %1217 = vmatmul.mubr.bf16.gmra.mrb[56].mxu1 %v3510_v37 }
 0x1f4   :  { %1224 = vmatprep.mubr.bf16.mxu1 %v3512_v38  ;;  %3274 = vmatmul.mubr.bf16.gmra.mrb[88].mxu0 %v3543_v39 }
 0x1f5   :  { %3277 = vmatprep.mubr.bf16.mxu0 %v3546_v40 }
 0x1fb   :  { %1225 = vmatmul.mubr.bf16.gmra.mrb[60].mxu1 %v3515_v41 }
 0x1fc   :  { %1232 = vmatprep.mubr.bf16.mxu1 %v3517_v42  ;;  %3278 = vmatmul.mubr.bf16.gmra.mrb[92].mxu0 %v3548_v43 }
 0x203   :  { %1233 = vmatmul.mubr.bf16.gmra.mrb[64].mxu1 %v3519_v46 }
 0x204   :  { %1240 = vmatprep.mubr.bf16.mxu1 %v3520_v47 }
 0x20b   :  { %1241 = vmatmul.mubr.bf16.gmra.mrb[68].mxu1 %v3522_v48 }
 0x20c   :  { %1248 = vmatprep.mubr.bf16.mxu1 %v3523_v49 }
 0x213   :  { %1249 = vmatmul.mubr.bf16.gmra.mrb[72].mxu1 %v3525_v50 }
 0x214   :  { %1256 = vmatprep.mubr.bf16.mxu1 %v3526_v51 }
 0x21b   :  { %1257 = vmatmul.mubr.bf16.gmra.mrb[76].mxu1 %v3528_v52 }
 0x21c   :  { %1264 = vmatprep.mubr.bf16.mxu1 %v3529_v53 }
 0x223   :  { %1265 = vmatmul.mubr.bf16.gmra.mrb[80].mxu1 %v3532_v54 }
 0x224   :  { %1272 = vmatprep.mubr.bf16.mxu1 %v3534_v55 }
 0x22b   :  { %1273 = vmatmul.mubr.bf16.gmra.mrb[84].mxu1 %v3537_v56 }
 0x22c   :  { %1280 = vmatprep.mubr.bf16.mxu1 %v3539_v57 }
 0x233   :  { %1281 = vmatmul.mubr.bf16.gmra.mrb[88].mxu1 %v3542_v58 }
 0x234   :  { %1288 = vmatprep.mubr.bf16.mxu1 %v3544_v59 }
 0x23b   :  { %1289 = vmatmul.mubr.bf16.gmra.mrb[92].mxu1 %v3547_v60 }
 0x23c   :  { %1946 = vmatprep.mubr.bf16.mxu1 %v4057_v33  ;;  %v4080_v33 = vld [vmem:[%s4668_s2] ss:$0 sm:$0xff] }
 0x256   :  { %v1106_v61 = vpop.f32.mrb[0].mxu1 }
 0x257   :  { %v1108_v62 = vpop.f32.mrb[1].mxu1  ;;  %v1107_v15 = vadd.f32 %v4080_v33, %v1106_v61 }
 0x258   :  { %v1109_v63 = vpop.f32.mrb[2].mxu1 }
 0x259   :  { %v1111_v0 = vpop.f32.mrb[3].mxu1  ;;  %v1110_v22 = vadd.f32 %v4080_v33, %v1109_v63 }
 0x25e   :  { %v1114_v1 = vpop.f32.mrb[4].mxu1 }
 0x25f   :  { %v1116_v2 = vpop.f32.mrb[5].mxu1  ;;  %v1115_v13 = vadd.f32 %v4080_v33, %v1114_v1 }
 0x260   :  { %v1117_v3 = vpop.f32.mrb[6].mxu1 }
 0x261   :  { %v1119_v4 = vpop.f32.mrb[7].mxu1  ;;  %v1118_v18 = vadd.f32 %v4080_v33, %v1117_v3 }
 0x266   :  { %v1122_v5 = vpop.f32.mrb[8].mxu1 }
 0x267   :  { %v1124_v6 = vpop.f32.mrb[9].mxu1  ;;  %v1123_v39 = vadd.f32 %v4080_v33, %v1122_v5 }
 0x268   :  { %v1125_v7 = vpop.f32.mrb[10].mxu1 }
 0x269   :  { %v1127_v8 = vpop.f32.mrb[11].mxu1  ;;  %v1126_v46 = vadd.f32 %v4080_v33, %v1125_v7 }
 0x26e   :  { %v1130_v9 = vpop.f32.mrb[12].mxu1 }
 0x26f   :  { %v1132_v10 = vpop.f32.mrb[13].mxu1  ;;  %v1131_v36 = vadd.f32 %v4080_v33, %v1130_v9 }
 0x270   :  { %v1133_v11 = vpop.f32.mrb[14].mxu1 }
 0x271   :  { %v1135_v12 = vpop.f32.mrb[15].mxu1  ;;  %v1134_v44 = vadd.f32 %v4080_v33, %v1133_v11 }
 0x276   :  { %v1138_v14 = vpop.f32.mrb[16].mxu1 }
 0x277   :  { %v3235_v16 = vpop.f32.mrb[48].mxu0  ;;  %v1140_v17 = vpop.f32.mrb[17].mxu1  ;;  %v1139_v61 = vadd.f32 %v4080_v33, %v1138_v14 }
 0x278   :  { %v1340_v19 = vadd.f32 %v3235_v16, %v1115_v13  ;;  %v1331_v20 = vpop.f32.mrb[49].mxu0  ;;  %v1141_v21 = vpop.f32.mrb[18].mxu1 }
 0x279   :  { %v1332_v23 = vadd.f32 %v1331_v20, %v1107_v15  ;;  %v3236_v24 = vpop.f32.mrb[50].mxu0  ;;  %v1143_v25 = vpop.f32.mrb[19].mxu1  ;;  %v1142_v4 = vadd.f32 %v4080_v33, %v1141_v21 }
 0x27a   :  { %v1343_v26 = vadd.f32 %v3236_v24, %v1118_v18  ;;  %v1334_v27 = vpop.f32.mrb[51].mxu0  ;;  %v1524_v29 = vmax.f32 %v1340_v19, 0.0 }
 0x27b   :  { %v1335_v28 = vadd.f32 %v1334_v27, %v1110_v22  ;;  %v1522_v31 = vmax.f32 %v1332_v23, 0.0 }
 0x27c   :  { %v1525_v30 = vmax.f32 %v1343_v26, 0.0 }
 0x27d   :  { %v1523_v34 = vmax.f32 %v1335_v28, 0.0 }
 0x27e   :  { %v1571_v35 = vpack.c.bf16 %v1525_v30, %v1524_v29  ;;  %v1146_v37 = vpop.f32.mrb[20].mxu1 }
 0x27f   :  { %v1570_v38 = vpack.c.bf16 %v1523_v34, %v1522_v31  ;;  %v3239_v40 = vpop.f32.mrb[52].mxu0  ;;  %v1148_v41 = vpop.f32.mrb[21].mxu1  ;;  %v1147_v58 = vadd.f32 %v4080_v33, %v1146_v37 }
 0x280   :  { %v1356_v42 = vadd.f32 %v3239_v40, %v1131_v36  ;;  %v1347_v43 = vpop.f32.mrb[53].mxu0  ;;  %v1149_v45 = vpop.f32.mrb[22].mxu1 }
 0x281   :  { %3297 = vmatprep.mubr.bf16.mxu0 %v1570_v38  ;;  %v1348_v47 = vadd.f32 %v1347_v43, %v1123_v39  ;;  %v3240_v48 = vpop.f32.mrb[54].mxu0  ;;  %v1151_v49 = vpop.f32.mrb[23].mxu1  ;;  %v1150_v2 = vadd.f32 %v4080_v33, %v1149_v45 }
 0x282   :  { %3298 = vmatmul.mubr.bf16.vlgmr.msra.gmra.mrb[96].mxu0 %v1571_v35  ;;  %v1359_v50 = vadd.f32 %v3240_v48, %v1134_v44  ;;  %v1350_v51 = vpop.f32.mrb[55].mxu0  ;;  %v1528_v53 = vmax.f32 %v1356_v42, 0.0 }
 0x283   :  { %v1351_v52 = vadd.f32 %v1350_v51, %v1126_v46  ;;  %v1526_v55 = vmax.f32 %v1348_v47, 0.0 }
 0x284   :  { %v1529_v54 = vmax.f32 %v1359_v50, 0.0 }
 0x285   :  { %v1527_v56 = vmax.f32 %v1351_v52, 0.0 }
 0x286   :  { %v1573_v57 = vpack.c.bf16 %v1529_v54, %v1528_v53  ;;  %v1154_v59 = vpop.f32.mrb[24].mxu1 }
 0x287   :  { %v1572_v60 = vpack.c.bf16 %v1527_v56, %v1526_v55  ;;  %v3243_v62 = vpop.f32.mrb[56].mxu0  ;;  %v1156_v63 = vpop.f32.mrb[25].mxu1  ;;  %v1155_v18 = vadd.f32 %v4080_v33, %v1154_v59 }
 0x288   :  { %v1372_v0 = vadd.f32 %v3243_v62, %v1147_v58  ;;  %v1363_v1 = vpop.f32.mrb[57].mxu0  ;;  %v1157_v3 = vpop.f32.mrb[26].mxu1 }
 0x289   :  { %3301 = vmatprep.mubr.bf16.mxu0 %v1572_v60  ;;  %v1364_v5 = vadd.f32 %v1363_v1, %v1139_v61  ;;  %v3244_v6 = vpop.f32.mrb[58].mxu0  ;;  %v1159_v7 = vpop.f32.mrb[27].mxu1  ;;  %v1158_v24 = vadd.f32 %v4080_v33, %v1157_v3 }
 0x28a   :  { %3302 = vmatmul.mubr.bf16.gmra.mrb[100].mxu0 %v1573_v57  ;;  %v1375_v8 = vadd.f32 %v3244_v6, %v1150_v2  ;;  %v1366_v9 = vpop.f32.mrb[59].mxu0  ;;  %v1532_v11 = vmax.f32 %v1372_v0, 0.0 }
 0x28b   :  { %v1367_v10 = vadd.f32 %v1366_v9, %v1142_v4  ;;  %v1530_v13 = vmax.f32 %v1364_v5, 0.0 }
 0x28c   :  { %v1533_v12 = vmax.f32 %v1375_v8, 0.0 }
 0x28d   :  { %v1531_v14 = vmax.f32 %v1367_v10, 0.0 }
 0x28e   :  { %v1575_v15 = vpack.c.bf16 %v1533_v12, %v1532_v11  ;;  %v1162_v16 = vpop.f32.mrb[28].mxu1 }
 0x28f   :  { %v1574_v17 = vpack.c.bf16 %v1531_v14, %v1530_v13  ;;  %v1163_v19 = vadd.f32 %v4080_v33, %v1162_v16  ;;  %v3247_v20 = vpop.f32.mrb[60].mxu0  ;;  %v1164_v21 = vpop.f32.mrb[29].mxu1 }
 0x290   :  { %v1379_v22 = vpop.f32.mrb[61].mxu0  ;;  %v1165_v23 = vpop.f32.mrb[30].mxu1 }
 0x291   :  { %3305 = vmatprep.mubr.bf16.mxu0 %v1574_v17  ;;  %v1388_v25 = vadd.f32 %v3247_v20, %v1163_v19  ;;  %v1380_v26 = vadd.f32 %v1379_v22, %v1155_v18  ;;  %v1166_v27 = vadd.f32 %v4080_v33, %v1165_v23  ;;  %v3248_v28 = vpop.f32.mrb[62].mxu0  ;;  %v1167_v29 = vpop.f32.mrb[31].mxu1 }
 0x292   :  { %3306 = vmatmul.mubr.bf16.gmra.mrb[104].mxu0 %v1575_v15  ;;  %v1382_v30 = vpop.f32.mrb[63].mxu0 }
 0x293   :  { %v1391_v31 = vadd.f32 %v3248_v28, %v1166_v27  ;;  %v1383_v34 = vadd.f32 %v1382_v30, %v1158_v24  ;;  %v1536_v35 = vmax.f32 %v1388_v25, 0.0  ;;  %v1534_v36 = vmax.f32 %v1380_v26, 0.0 }
 0x295   :  { %v1537_v37 = vmax.f32 %v1391_v31, 0.0  ;;  %v1535_v38 = vmax.f32 %v1383_v34, 0.0 }
 0x296   :  { %v1170_v39 = vpop.f32.mrb[32].mxu1 }
 0x297   :  { %v1577_v40 = vpack.c.bf16 %v1537_v37, %v1536_v35  ;;  %v1576_v41 = vpack.c.bf16 %v1535_v38, %v1534_v36  ;;  %v1171_v42 = vadd.f32 %v4080_v33, %v1170_v39  ;;  %v1172_v43 = vpop.f32.mrb[33].mxu1  ;;  %v3251_v44 = vpop.f32.mrb[64].mxu0 }
 0x298   :  { %v1173_v45 = vpop.f32.mrb[34].mxu1  ;;  %v1395_v46 = vpop.f32.mrb[65].mxu0 }
 0x299   :  { %v1174_v47 = vadd.f32 %v4080_v33, %v1173_v45  ;;  %v1175_v48 = vpop.f32.mrb[35].mxu1  ;;  %v1396_v49 = vadd.f32 %v1395_v46, %v1171_v42  ;;  %v3252_v50 = vpop.f32.mrb[66].mxu0  ;;  %3309 = vmatprep.mubr.bf16.mxu0 %v1576_v41 }
 0x29a   :  { %v1398_v51 = vpop.f32.mrb[67].mxu0  ;;  %3310 = vmatmul.mubr.bf16.gmra.mrb[108].mxu0 %v1577_v40 }
 0x29b   :  { %v1399_v52 = vadd.f32 %v1398_v51, %v1174_v47  ;;  %v1538_v53 = vmax.f32 %v1396_v49, 0.0 }
 0x29d   :  { %v1539_v54 = vmax.f32 %v1399_v52, 0.0 }
 0x29e   :  { %v1178_v55 = vpop.f32.mrb[36].mxu1 }
 0x29f   :  { %v1179_v56 = vadd.f32 %v4080_v33, %v1178_v55  ;;  %v1180_v57 = vpop.f32.mrb[37].mxu1  ;;  %v1578_v58 = vpack.c.bf16 %v1539_v54, %v1538_v53  ;;  %v3255_v59 = vpop.f32.mrb[68].mxu0 }
 0x2a0   :  { %v1181_v60 = vpop.f32.mrb[38].mxu1  ;;  %v1411_v61 = vpop.f32.mrb[69].mxu0 }
 0x2a1   :  { %v1404_v62 = vadd.f32 %v3251_v44, %v1179_v56  ;;  %v1182_v63 = vadd.f32 %v4080_v33, %v1181_v60  ;;  %v1183_v0 = vpop.f32.mrb[39].mxu1  ;;  %v3256_v1 = vpop.f32.mrb[70].mxu0  ;;  %3313 = vmatprep.mubr.bf16.mxu0 %v1578_v58 }
 0x2a2   :  { %v1414_v2 = vpop.f32.mrb[71].mxu0 }
 0x2a3   :  { %v1407_v3 = vadd.f32 %v3252_v50, %v1182_v63  ;;  %v1540_v4 = vmax.f32 %v1404_v62, 0.0 }
 0x2a5   :  { %v1541_v5 = vmax.f32 %v1407_v3, 0.0 }
 0x2a6   :  { %v1186_v6 = vpop.f32.mrb[40].mxu1 }
 0x2a7   :  { %v1579_v7 = vpack.c.bf16 %v1541_v5, %v1540_v4  ;;  %v1187_v8 = vadd.f32 %v4080_v33, %v1186_v6  ;;  %v1188_v9 = vpop.f32.mrb[41].mxu1  ;;  %v3259_v10 = vpop.f32.mrb[72].mxu0 }
 0x2a8   :  { %v1189_v11 = vpop.f32.mrb[42].mxu1  ;;  %v1427_v12 = vpop.f32.mrb[73].mxu0 }
 0x2a9   :  { %v1190_v13 = vadd.f32 %v4080_v33, %v1189_v11  ;;  %v1191_v14 = vpop.f32.mrb[43].mxu1  ;;  %v1412_v15 = vadd.f32 %v1411_v61, %v1187_v8  ;;  %3314 = vmatmul.mubr.bf16.gmra.mrb[112].mxu0 %v1579_v7  ;;  %v3260_v16 = vpop.f32.mrb[74].mxu0 }
 0x2aa   :  { %v1430_v17 = vpop.f32.mrb[75].mxu0 }
 0x2ab   :  { %v1415_v18 = vadd.f32 %v1414_v2, %v1190_v13  ;;  %v1542_v19 = vmax.f32 %v1412_v15, 0.0 }
 0x2ad   :  { %v1543_v20 = vmax.f32 %v1415_v18, 0.0 }
 0x2ae   :  { %v1194_v21 = vpop.f32.mrb[44].mxu1 }
 0x2af   :  { %v1195_v22 = vadd.f32 %v4080_v33, %v1194_v21  ;;  %v1196_v23 = vpop.f32.mrb[45].mxu1  ;;  %v1580_v24 = vpack.c.bf16 %v1543_v20, %v1542_v19  ;;  %v4105_v25 = vpop.f32.mrb[76].mxu0 }
 0x2b0   :  { %v1197_v26 = vpop.f32.mrb[46].mxu1  ;;  %v1443_v27 = vpop.f32.mrb[77].mxu0 }
 0x2b1   :  { %v1420_v28 = vadd.f32 %v3255_v59, %v1195_v22  ;;  %v1198_v29 = vadd.f32 %v4080_v33, %v1197_v26  ;;  %v1199_v30 = vpop.f32.mrb[47].mxu1  ;;  %3317 = vmatprep.mubr.bf16.mxu0 %v1580_v24  ;;  %v4108_v31 = vpop.f32.mrb[78].mxu0 }
 0x2b2   :  { %v1446_v34 = vpop.f32.mrb[79].mxu0 }
 0x2b3   :  { %v1423_v35 = vadd.f32 %v3256_v1, %v1198_v29  ;;  %v1544_v36 = vmax.f32 %v1420_v28, 0.0 }
 0x2b5   :  { %v1545_v37 = vmax.f32 %v1423_v35, 0.0 }
 0x2b6   :  { %v1202_v38 = vpop.f32.mrb[48].mxu1 }
 0x2b7   :  { %v1581_v39 = vpack.c.bf16 %v1545_v37, %v1544_v36  ;;  %v1203_v40 = vadd.f32 %v4080_v33, %v1202_v38  ;;  %v1204_v41 = vpop.f32.mrb[49].mxu1  ;;  %v4111_v42 = vpop.f32.mrb[80].mxu0 }
 0x2b8   :  { %v1205_v43 = vpop.f32.mrb[50].mxu1  ;;  %v4113_v44 = vpop.f32.mrb[81].mxu0 }
 0x2b9   :  { %v1206_v45 = vadd.f32 %v4080_v33, %v1205_v43  ;;  %v1207_v46 = vpop.f32.mrb[51].mxu1  ;;  %v1428_v47 = vadd.f32 %v1427_v12, %v1203_v40  ;;  %3318 = vmatmul.mubr.bf16.gmra.mrb[116].mxu0 %v1581_v39  ;;  %v4116_v48 = vpop.f32.mrb[82].mxu0 }
 0x2ba   :  { %v1462_v49 = vpop.f32.mrb[83].mxu0 }
 0x2bb   :  { %v1431_v50 = vadd.f32 %v1430_v17, %v1206_v45  ;;  %v1546_v51 = vmax.f32 %v1428_v47, 0.0 }
 0x2bd   :  { %v1547_v52 = vmax.f32 %v1431_v50, 0.0 }
 0x2be   :  { %v1210_v53 = vpop.f32.mrb[52].mxu1 }
 0x2bf   :  { %v1211_v54 = vadd.f32 %v4080_v33, %v1210_v53  ;;  %v1212_v55 = vpop.f32.mrb[53].mxu1  ;;  %v1582_v56 = vpack.c.bf16 %v1547_v52, %v1546_v51  ;;  %v4119_v57 = vpop.f32.mrb[84].mxu0 }
 0x2c0   :  { %v1213_v58 = vpop.f32.mrb[54].mxu1  ;;  %v4121_v59 = vpop.f32.mrb[85].mxu0 }
 0x2c1   :  { %v1436_v60 = vadd.f32 %v3259_v10, %v1211_v54  ;;  %v1214_v61 = vadd.f32 %v4080_v33, %v1213_v58  ;;  %v1215_v62 = vpop.f32.mrb[55].mxu1  ;;  %3321 = vmatprep.mubr.bf16.mxu0 %v1582_v56  ;;  %v4124_v63 = vpop.f32.mrb[86].mxu0 }
 0x2c2   :  { %v4126_v0 = vpop.f32.mrb[87].mxu0 }
 0x2c3   :  { %v1439_v1 = vadd.f32 %v3260_v16, %v1214_v61  ;;  %v1548_v2 = vmax.f32 %v1436_v60, 0.0 }
 0x2c5   :  { %v1549_v3 = vmax.f32 %v1439_v1, 0.0 }
 0x2c6   :  { %v1218_v4 = vpop.f32.mrb[56].mxu1 }
 0x2c7   :  { %v1583_v5 = vpack.c.bf16 %v1549_v3, %v1548_v2  ;;  %v1219_v6 = vadd.f32 %v4080_v33, %v1218_v4  ;;  %v1220_v7 = vpop.f32.mrb[57].mxu1  ;;  %v4129_v8 = vpop.f32.mrb[88].mxu0 }
 0x2c8   :  { %v1221_v9 = vpop.f32.mrb[58].mxu1  ;;  %v4131_v10 = vpop.f32.mrb[89].mxu0 }
 0x2c9   :  { %v1222_v11 = vadd.f32 %v4080_v33, %v1221_v9  ;;  %v1223_v12 = vpop.f32.mrb[59].mxu1  ;;  %v1444_v13 = vadd.f32 %v1443_v27, %v1219_v6  ;;  %3322 = vmatmul.mubr.bf16.gmra.mrb[120].mxu0 %v1583_v5  ;;  %v4134_v14 = vpop.f32.mrb[90].mxu0 }
 0x2ca   :  { %v4136_v15 = vpop.f32.mrb[91].mxu0 }
 0x2cb   :  { %v1447_v16 = vadd.f32 %v1446_v34, %v1222_v11  ;;  %v1550_v17 = vmax.f32 %v1444_v13, 0.0 }
 0x2cd   :  { %v1551_v18 = vmax.f32 %v1447_v16, 0.0 }
 0x2ce   :  { %v1226_v19 = vpop.f32.mrb[60].mxu1 }
 0x2cf   :  { %v1227_v20 = vadd.f32 %v4080_v33, %v1226_v19  ;;  %v1228_v21 = vpop.f32.mrb[61].mxu1  ;;  %v1584_v22 = vpack.c.bf16 %v1551_v18, %v1550_v17  ;;  %v4139_v23 = vpop.f32.mrb[92].mxu0 }
 0x2d0   :  { %v1229_v24 = vpop.f32.mrb[62].mxu1  ;;  %v4141_v26 = vpop.f32.mrb[93].mxu0 }
 0x2d1   :  { %v1452_v27 = vadd.f32 %v4105_v25, %v1227_v20  ;;  %v1230_v28 = vadd.f32 %v4080_v33, %v1229_v24  ;;  %3325 = vmatprep.mubr.bf16.mxu0 %v1584_v22  ;;  %v1231_v29 = vpop.f32.mrb[63].mxu1  ;;  %v4145_v30 = vpop.f32.mrb[94].mxu0 }
 0x2d2   :  { %v4147_v34 = vpop.f32.mrb[95].mxu0 }
 0x2d3   :  { %v1455_v35 = vadd.f32 %v4108_v31, %v1230_v28  ;;  %v1552_v36 = vmax.f32 %v1452_v27, 0.0 }
 0x2d5   :  { %v1553_v37 = vmax.f32 %v1455_v35, 0.0 }
 0x2d6   :  { %v1234_v38 = vpop.f32.mrb[64].mxu1 }
 0x2d7   :  { %v1585_v39 = vpack.c.bf16 %v1553_v37, %v1552_v36  ;;  %v1235_v40 = vadd.f32 %v4080_v33, %v1234_v38  ;;  %v1236_v41 = vpop.f32.mrb[65].mxu1 }
 0x2d8   :  { %v1237_v43 = vpop.f32.mrb[66].mxu1 }
 0x2d9   :  { %3326 = vmatmul.mubr.bf16.gmra.mrb[124].mxu0 %v1585_v39  ;;  %v1238_v25 = vadd.f32 %v4080_v33, %v1237_v43  ;;  %v1239_v45 = vpop.f32.mrb[67].mxu1  ;;  %v1460_v46 = vadd.f32 %v4113_v44, %v1235_v40 }
 0x2db   :  { %v1554_v47 = vmax.f32 %v1460_v46, 0.0  ;;  %v1463_v50 = vadd.f32 %v1462_v49, %v1238_v25 }
 0x2dd   :  { %v1555_v51 = vmax.f32 %v1463_v50, 0.0 }
 0x2de   :  { %v1242_v52 = vpop.f32.mrb[68].mxu1 }
 0x2df   :  { %v1243_v31 = vadd.f32 %v4080_v33, %v1242_v52  ;;  %v1244_v53 = vpop.f32.mrb[69].mxu1  ;;  %v1586_v54 = vpack.c.bf16 %v1555_v51, %v1554_v47 }
 0x2e0   :  { %v1245_v55 = vpop.f32.mrb[70].mxu1 }
 0x2e1   :  { %v1468_v56 = vadd.f32 %v4111_v42, %v1243_v31  ;;  %v1246_v58 = vadd.f32 %v4080_v33, %v1245_v55  ;;  %v1247_v60 = vpop.f32.mrb[71].mxu1  ;;  %3329 = vmatprep.mubr.bf16.mxu0 %v1586_v54 }
 0x2e3   :  { %v1556_v61 = vmax.f32 %v1468_v56, 0.0  ;;  %v1471_v62 = vadd.f32 %v4116_v48, %v1246_v58 }
 0x2e5   :  { %v1557_v1 = vmax.f32 %v1471_v62, 0.0 }
 0x2e6   :  { %v1250_v44 = vpop.f32.mrb[72].mxu1 }
 0x2e7   :  { %v1587_v2 = vpack.c.bf16 %v1557_v1, %v1556_v61  ;;  %v1251_v49 = vadd.f32 %v4080_v33, %v1250_v44  ;;  %v1252_v3 = vpop.f32.mrb[73].mxu1 }
 0x2e8   :  { %v1253_v4 = vpop.f32.mrb[74].mxu1 }
 0x2e9   :  { %v1254_v5 = vadd.f32 %v4080_v33, %v1253_v4  ;;  %v1255_v6 = vpop.f32.mrb[75].mxu1  ;;  %v1476_v7 = vadd.f32 %v4121_v59, %v1251_v49  ;;  %3330 = vmatmul.mubr.bf16.gmra.mrb[128].mxu0 %v1587_v2 }
 0x2eb   :  { %v1558_v42 = vmax.f32 %v1476_v7, 0.0  ;;  %v1479_v9 = vadd.f32 %v4126_v0, %v1254_v5 }
 0x2ed   :  { %v1559_v11 = vmax.f32 %v1479_v9, 0.0 }
 0x2ee   :  { %v1258_v12 = vpop.f32.mrb[76].mxu1 }
 0x2ef   :  { %v1259_v48 = vadd.f32 %v4080_v33, %v1258_v12  ;;  %v1260_v13 = vpop.f32.mrb[77].mxu1  ;;  %v1588_v16 = vpack.c.bf16 %v1559_v11, %v1558_v42 }
 0x2f0   :  { %v1261_v17 = vpop.f32.mrb[78].mxu1 }
 0x2f1   :  { %v1484_v18 = vadd.f32 %v4119_v57, %v1259_v48  ;;  %v1262_v19 = vadd.f32 %v4080_v33, %v1261_v17  ;;  %v1263_v20 = vpop.f32.mrb[79].mxu1  ;;  %3333 = vmatprep.mubr.bf16.mxu0 %v1588_v16 }
 0x2f3   :  { %v1560_v21 = vmax.f32 %v1484_v18, 0.0  ;;  %v1487_v59 = vadd.f32 %v4124_v63, %v1262_v19 }
 0x2f5   :  { %v1561_v22 = vmax.f32 %v1487_v59, 0.0 }
 0x2f6   :  { %v1266_v24 = vpop.f32.mrb[80].mxu1 }
 0x2f7   :  { %v1589_v27 = vpack.c.bf16 %v1561_v22, %v1560_v21  ;;  %v1267_v0 = vadd.f32 %v4080_v33, %v1266_v24  ;;  %v1268_v28 = vpop.f32.mrb[81].mxu1 }
 0x2f8   :  { %v1269_v29 = vpop.f32.mrb[82].mxu1 }
 0x2f9   :  { %v1270_v35 = vadd.f32 %v4080_v33, %v1269_v29  ;;  %v1271_v36 = vpop.f32.mrb[83].mxu1  ;;  %v1492_v37 = vadd.f32 %v4131_v10, %v1267_v0  ;;  %3334 = vmatmul.mubr.bf16.gmra.mrb[132].mxu0 %v1589_v27 }
 0x2fb   :  { %v1562_v57 = vmax.f32 %v1492_v37, 0.0  ;;  %v1495_v38 = vadd.f32 %v4136_v15, %v1270_v35 }
 0x2fd   :  { %v1563_v39 = vmax.f32 %v1495_v38, 0.0 }
 0x2fe   :  { %v1274_v40 = vpop.f32.mrb[84].mxu1 }
 0x2ff   :  { %v1275_v63 = vadd.f32 %v4080_v33, %v1274_v40  ;;  %v1276_v41 = vpop.f32.mrb[85].mxu1  ;;  %v1590_v43 = vpack.c.bf16 %v1563_v39, %v1562_v57 }
 0x300   :  { %v1277_v25 = vpop.f32.mrb[86].mxu1 }
 0x301   :  { %v1500_v45 = vadd.f32 %v4129_v8, %v1275_v63  ;;  %v1278_v46 = vadd.f32 %v4080_v33, %v1277_v25  ;;  %v1279_v47 = vpop.f32.mrb[87].mxu1  ;;  %3337 = vmatprep.mubr.bf16.mxu0 %v1590_v43 }
 0x303   :  { %v1564_v50 = vmax.f32 %v1500_v45, 0.0  ;;  %v1503_v10 = vadd.f32 %v4134_v14, %v1278_v46 }
 0x305   :  { %v1565_v51 = vmax.f32 %v1503_v10, 0.0 }
 0x306   :  { %v1282_v52 = vpop.f32.mrb[88].mxu1 }
 0x307   :  { %v1591_v31 = vpack.c.bf16 %v1565_v51, %v1564_v50  ;;  %v1283_v15 = vadd.f32 %v4080_v33, %v1282_v52  ;;  %v1284_v53 = vpop.f32.mrb[89].mxu1 }
 0x308   :  { %v1285_v54 = vpop.f32.mrb[90].mxu1 }
 0x309   :  { %v1286_v55 = vadd.f32 %v4080_v33, %v1285_v54  ;;  %v1287_v56 = vpop.f32.mrb[91].mxu1  ;;  %v1508_v58 = vadd.f32 %v4141_v26, %v1283_v15  ;;  %3338 = vmatmul.mubr.bf16.gmra.mrb[136].mxu0 %v1591_v31 }
 0x30b   :  { %v1566_v8 = vmax.f32 %v1508_v58, 0.0  ;;  %v1511_v60 = vadd.f32 %v4147_v34, %v1286_v55  ;;  %v3749_v34 = vld [vmem:[#allocation8 + $0x8] ss:$12 sps:$4 sm:$0xff]  }
 0x30d   :  { %v1567_v61 = vmax.f32 %v1511_v60, 0.0  ;;  %v3750_v60 = vld [vmem:[#allocation8] ss:$12 sps:$4 sm:$0xff]  }
 0x30e   :  { %v1290_v62 = vpop.f32.mrb[92].mxu1 }
 0x30f   :  { %v1291_v14 = vadd.f32 %v4080_v33, %v1290_v62  ;;  %v1292_v1 = vpop.f32.mrb[93].mxu1  ;;  %v1592_v44 = vpack.c.bf16 %v1567_v61, %v1566_v8  ;;  %v3751_v61 = vld [vmem:[#allocation8 + $0x1c] ss:$12 sps:$4 sm:$0xff]  }
 0x310   :  { %v1293_v2 = vpop.f32.mrb[94].mxu1 }
 0x311   :  { %v1516_v49 = vadd.f32 %v4139_v23, %v1291_v14  ;;  %v1294_v3 = vadd.f32 %v4080_v33, %v1293_v2  ;;  %3341 = vmatprep.mubr.bf16.mxu0 %v1592_v44  ;;  %v1295_v4 = vpop.f32.mrb[95].mxu1 }
 0x312   :  { %v3753_v4 = vld [vmem:[#allocation8 + $0x34] ss:$12 sps:$4 sm:$0xff]  }
 0x313   :  { %v1568_v5 = vmax.f32 %v1516_v49, 0.0  ;;  %v1519_v26 = vadd.f32 %v4145_v30, %v1294_v3  ;;  %v3752_v3 = vld [vmem:[#allocation8 + $0x18] ss:$12 sps:$4 sm:$0xff]  }
 0x315   :  { %v1569_v6 = vmax.f32 %v1519_v26, 0.0 }
 0x317   :  { %v1593_v7 = vpack.c.bf16 %v1569_v6, %v1568_v5  ;;  %v3755_v5 = vld [vmem:[#allocation8 + $0x4c] ss:$12 sps:$4 sm:$0xff]  }
 0x319   :  { %3342 = vmatmul.mubr.bf16.gmra.mrb[140].mxu0 %v1593_v7 }
 0x31a   :  { %3361 = vmatprep.mubr.bf16.mxu0 %v3749_v34 }
 0x355   :  { %v3299_v42 = vpop.f32.mrb[96].mxu0 }
 0x356   :  { %v1692_v9 = vpop.f32.mrb[97].mxu0 }
 0x357   :  { %v3300_v11 = vpop.f32.mrb[98].mxu0 }
 0x358   :  { %v1884_v12 = vpack.c.bf16 %v3300_v11, %v3299_v42  ;;  %v1695_v48 = vpop.f32.mrb[99].mxu0  ;;  %v3756_v11 = vld [vmem:[#allocation8 + $0x48] ss:$12 sps:$4 sm:$0xff]  }
 0x359   :  { %v1883_v13 = vpack.c.bf16 %v1695_v48, %v1692_v9  ;;  %v3758_v48 = vld [vmem:[#allocation8 + $0x60] ss:$12 sps:$4 sm:$0xff]  }
 0x35b   :  { %1915 = vmatpush1.bf16.msra.mxu1 %v1883_v13  ;;  %v3759_v13 = vld [vmem:[#allocation8 + $0x7c] ss:$12 sps:$4 sm:$0xff]  }
 0x35c   :  { %1916 = vmatprep.subr.bf16.mxu1 %v3946_v32 }
 0x35d   :  { %v3303_v33 = vpop.f32.mrb[100].mxu0 }
 0x35e   :  { %v1708_v23 = vpop.f32.mrb[101].mxu0 }
 0x35f   :  { %1917 = vmatpush1.bf16.msra.mxu1 %v1884_v12  ;;  %v3304_v16 = vpop.f32.mrb[102].mxu0  ;;  %v3757_v12 = vld [vmem:[#allocation8 + $0x64] ss:$12 sps:$4 sm:$0xff]  }
 0x360   :  { %v1886_v17 = vpack.c.bf16 %v3304_v16, %v3303_v33  ;;  %v1711_v30 = vpop.f32.mrb[103].mxu0  ;;  %1918 = vmatprep.subr.bf16.mxu1 %v3946_v32 }
 0x361   :  { %v1885_v18 = vpack.c.bf16 %v1711_v30, %v1708_v23 }
 0x363   :  { %1919 = vmatpush1.bf16.msra.mxu1 %v1885_v18 }
 0x364   :  { %1920 = vmatprep.subr.bf16.mxu1 %v3946_v32 }
 0x365   :  { %v3307_v19 = vpop.f32.mrb[104].mxu0 }
 0x366   :  { %v1724_v20 = vpop.f32.mrb[105].mxu0 }
 0x367   :  { %1921 = vmatpush1.bf16.msra.mxu1 %v1886_v17  ;;  %v3308_v21 = vpop.f32.mrb[106].mxu0 }
 0x368   :  { %v1888_v59 = vpack.c.bf16 %v3308_v21, %v3307_v19  ;;  %v1727_v22 = vpop.f32.mrb[107].mxu0  ;;  %1922 = vmatprep.subr.bf16.mxu1 %v3946_v32  ;;  %v3760_v19 = vld [vmem:[#allocation8 + $0x78] ss:$12 sps:$4 sm:$0xff]   ;;  %v3762_v21 = vld [vmem:[#allocation8 + $0x90] ss:$12 sps:$4 sm:$0xff]  }
 0x369   :  { %v1887_v24 = vpack.c.bf16 %v1727_v22, %v1724_v20  ;;  %v3761_v20 = vld [vmem:[#allocation8 + $0x94] ss:$12 sps:$4 sm:$0xff]  }
 0x36b   :  { %1923 = vmatpush1.bf16.msra.mxu1 %v1887_v24 }
 0x36c   :  { %1924 = vmatprep.subr.bf16.mxu1 %v3946_v32 }
 0x36d   :  { %v3311_v27 = vpop.f32.mrb[108].mxu0 }
 0x36e   :  { %v1740_v0 = vpop.f32.mrb[109].mxu0 }
 0x36f   :  { %1925 = vmatpush1.bf16.msra.mxu1 %v1888_v59  ;;  %v3312_v28 = vpop.f32.mrb[110].mxu0  ;;  %v3763_v59 = vld [vmem:[#allocation8 + $0xac] ss:$12 sps:$4 sm:$0xff]  }
 0x370   :  { %v1890_v29 = vpack.c.bf16 %v3312_v28, %v3311_v27  ;;  %v1743_v35 = vpop.f32.mrb[111].mxu0  ;;  %1926 = vmatprep.subr.bf16.mxu1 %v3946_v32 }
 0x371   :  { %v1889_v36 = vpack.c.bf16 %v1743_v35, %v1740_v0  ;;  %v3764_v35 = vld [vmem:[#allocation8 + $0xa8] ss:$12 sps:$4 sm:$0xff]  }
 0x373   :  { %1927 = vmatpush1.bf16.msra.mxu1 %v1889_v36  ;;  %v3765_v36 = vld [vmem:[#allocation8 + $0xc4] ss:$12 sps:$4 sm:$0xff]  }
 0x374   :  { %1928 = vmatprep.subr.bf16.mxu1 %v3946_v32 }
 0x377   :  { %1929 = vmatpush1.bf16.msra.mxu1 %v1890_v29 }
 0x378   :  { %1930 = vmatprep.subr.bf16.mxu1 %v3946_v32 }
 0x37c   :  { %v3315_v37 = vpop.f32.mrb[112].mxu0 }
 0x37d   :  { %v1756_v57 = vpop.f32.mrb[113].mxu0 }
 0x37e   :  { %v3316_v38 = vpop.f32.mrb[114].mxu0 }
 0x37f   :  { %v1892_v39 = vpack.c.bf16 %v3316_v38, %v3315_v37  ;;  %v1759_v40 = vpop.f32.mrb[115].mxu0  ;;  %v3766_v37 = vld [vmem:[#allocation8 + $0xc0] ss:$12 sps:$4 sm:$0xff]   ;;  %v3768_v38 = vld [vmem:[#allocation8 + $0xdc] ss:$12 sps:$4 sm:$0xff]  }
 0x380   :  { %v1891_v63 = vpack.c.bf16 %v1759_v40, %v1756_v57  ;;  %v3767_v57 = vld [vmem:[#allocation8 + $0x20] ss:$12 sps:$4 sm:$0xff]   ;;  %v3770_v40 = vld [vmem:[#allocation8 + $0xd8] ss:$12 sps:$4 sm:$0xff]  }
 0x382   :  { %1931 = vmatpush1.bf16.msra.mxu1 %v1891_v63  ;;  %v3771_v63 = vld [vmem:[#allocation8 + $0x50] ss:$12 sps:$4 sm:$0xff]  }
 0x383   :  { %1932 = vmatprep.subr.bf16.mxu1 %v3946_v32 }
 0x386   :  { %1933 = vmatpush1.bf16.msra.mxu1 %v1892_v39  ;;  %v3769_v39 = vld [vmem:[#allocation8 + $0x38] ss:$12 sps:$4 sm:$0xff]  }
 0x387   :  { %1934 = vmatprep.subr.bf16.mxu1 %v3946_v32 }
 0x38c   :  { %v3319_v41 = vpop.f32.mrb[116].mxu0 }
 0x38d   :  { %v1772_v43 = vpop.f32.mrb[117].mxu0 }
 0x38e   :  { %v3320_v25 = vpop.f32.mrb[118].mxu0 }
 0x38f   :  { %v1894_v45 = vpack.c.bf16 %v3320_v25, %v3319_v41  ;;  %v1775_v46 = vpop.f32.mrb[119].mxu0  ;;  %v3772_v41 = vld [vmem:[#allocation8 + $0xf4] ss:$12 sps:$4 sm:$0xff]   ;;  %v3774_v25 = vld [vmem:[#allocation8 + $0xf0] ss:$12 sps:$4 sm:$0xff]  }
 0x390   :  { %v1893_v47 = vpack.c.bf16 %v1775_v46, %v1772_v43  ;;  %v3773_v43 = vld [vmem:[#allocation8 + $0x68] ss:$12 sps:$4 sm:$0xff]   ;;  %v3776_v46 = vld [vmem:[#allocation8 + $0x10c] ss:$12 sps:$4 sm:$0xff]  }
 0x392   :  { %1935 = vmatpush1.bf16.msra.mxu1 %v1893_v47  ;;  %v3777_v47 = vld [vmem:[#allocation8 + $0x98] ss:$12 sps:$4 sm:$0xff]  }
 0x393   :  { %1936 = vmatprep.subr.bf16.mxu1 %v3946_v32 }
 0x396   :  { %1937 = vmatpush1.bf16.msra.mxu1 %v1894_v45  ;;  %v3775_v45 = vld [vmem:[#allocation8 + $0x80] ss:$12 sps:$4 sm:$0xff]  }
 0x397   :  { %1938 = vmatprep.subr.bf16.mxu1 %v3946_v32 }
 0x39c   :  { %v3323_v50 = vpop.f32.mrb[120].mxu0 }
 0x39d   :  { %v1788_v10 = vpop.f32.mrb[121].mxu0 }
 0x39e   :  { %v3324_v51 = vpop.f32.mrb[122].mxu0 }
 0x39f   :  { %v1896_v52 = vpack.c.bf16 %v3324_v51, %v3323_v50  ;;  %v1791_v31 = vpop.f32.mrb[123].mxu0  ;;  %v3778_v50 = vld [vmem:[#allocation8 + $0x108] ss:$12 sps:$4 sm:$0xff]   ;;  %v3780_v51 = vld [vmem:[#allocation8 + $0x124] ss:$12 sps:$4 sm:$0xff]  }
 0x3a0   :  { %v1895_v15 = vpack.c.bf16 %v1791_v31, %v1788_v10  ;;  %v3779_v10 = vld [vmem:[#allocation8 + $0xb0] ss:$12 sps:$4 sm:$0xff]   ;;  %v3782_v31 = vld [vmem:[#allocation8 + $0x120] ss:$12 sps:$4 sm:$0xff]  }
 0x3a2   :  { %1939 = vmatpush1.bf16.msra.mxu1 %v1895_v15  ;;  %v3783_v15 = vld [vmem:[#allocation8 + $0xe0] ss:$12 sps:$4 sm:$0xff]  }
 0x3a3   :  { %1940 = vmatprep.subr.bf16.mxu1 %v3946_v32 }
 0x3a6   :  { %1941 = vmatpush1.bf16.msra.mxu1 %v1896_v52  ;;  %v3781_v52 = vld [vmem:[#allocation8 + $0xc8] ss:$12 sps:$4 sm:$0xff]  }
 0x3a7   :  { %1942 = vmatprep.subr.bf16.mxu1 %v3946_v32 }
 0x3ac   :  { %v3327_v53 = vpop.f32.mrb[124].mxu0 }
 0x3ad   :  { %v1804_v54 = vpop.f32.mrb[125].mxu0 }
 0x3ae   :  { %v3328_v55 = vpop.f32.mrb[126].mxu0 }
 0x3af   :  { %v1898_v56 = vpack.c.bf16 %v3328_v55, %v3327_v53  ;;  %v1807_v58 = vpop.f32.mrb[127].mxu0  ;;  %v3784_v53 = vld [vmem:[#allocation8 + $0x13c] ss:$12 sps:$4 sm:$0xff]   ;;  %v3786_v55 = vld [vmem:[#allocation8 + $0x138] ss:$12 sps:$4 sm:$0xff]  }
 0x3b0   :  { %v1897_v8 = vpack.c.bf16 %v1807_v58, %v1804_v54  ;;  %v3785_v54 = vld [vmem:[#allocation8 + $0xf8] ss:$12 sps:$4 sm:$0xff]   ;;  %v3788_v58 = vld [vmem:[#allocation8 + $0x154] ss:$12 sps:$4 sm:$0xff]  }
 0x3b2   :  { %1943 = vmatpush1.bf16.msra.mxu1 %v1897_v8  ;;  %v3789_v8 = vld [vmem:[#allocation8 + $0x128] ss:$12 sps:$4 sm:$0xff]  }
 0x3b3   :  { %1944 = vmatprep.subr.bf16.mxu1 %v3946_v32  ;;  %v3754_v32 = vld [vmem:[#allocation8 + $0x30] ss:$12 sps:$4 sm:$0xff]  }
 0x3b6   :  { %1945 = vmatpush1.bf16.msra.mxu1 %v1898_v56  ;;  %v3787_v56 = vld [vmem:[#allocation8 + $0x110] ss:$12 sps:$4 sm:$0xff]  }
 0x3b9   :  { %1947 = vmatmul.mubr.bf16.vlgmr.msra.gmra.mrb[96].mxu1 %v3750_v60  ;;  %v3790_v60 = vld [vmem:[#allocation8 + $0x150] ss:$12 sps:$4 sm:$0xff]  }
 0x3ba   :  { %1954 = vmatprep.mubr.bf16.mxu1 %v3751_v61  ;;  %v3791_v61 = vld [vmem:[#allocation8 + $0x140] ss:$12 sps:$4 sm:$0xff]  }
 0x3bc   :  { %v3331_v62 = vpop.f32.mrb[128].mxu0 }
 0x3bd   :  { %v1820_v14 = vpop.f32.mrb[129].mxu0 }
 0x3be   :  { %v3332_v1 = vpop.f32.mrb[130].mxu0 }
 0x3bf   :  { %v1900_v44 = vpack.c.bf16 %v3332_v1, %v3331_v62  ;;  %v1823_v2 = vpop.f32.mrb[131].mxu0  ;;  %v3792_v62 = vld [vmem:[#allocation8 + $0x16c] ss:$12 sps:$4 sm:$0xff]   ;;  %v3794_v1 = vld [vmem:[#allocation8 + $0x168] ss:$12 sps:$4 sm:$0xff]  }
 0x3c0   :  { %v1899_v49 = vpack.c.bf16 %v1823_v2, %v1820_v14  ;;  %v3793_v14 = vld [vmem:[#allocation8 + $0x158] ss:$12 sps:$4 sm:$0xff]  }
 0x3c1   :  { %1955 = vmatmul.mubr.bf16.gmra.mrb[100].mxu1 %v3752_v3  ;;  %v3796_v2 = vld [vmem:[#allocation8 + $0x184] ss:$12 sps:$4 sm:$0xff]   ;;  %v3798_v3 = vld [vmem:[#allocation8 + $0x180] ss:$12 sps:$4 sm:$0xff]  }
 0x3c2   :  { %1962 = vmatprep.mubr.bf16.mxu1 %v3753_v4  ;;  %3345 = vmatprep.subr.bf16.mxu0 %v1899_v49  ;;  %v3799_v4 = vld [vmem:[#allocation8 + $0x1a0] ss:$12 sps:$4 sm:$0xff]  }
 0x3c3   :  { %3346 = vmatpush3.bf16.msra.mxu0 %v1899_v49  ;;  %v3797_v49 = vld [vmem:[#allocation8 + $0x188] ss:$12 sps:$4 sm:$0xff]  }
 0x3c4   :  { %3347 = vmatprep.subr.bf16.mxu0 %v1900_v44 }
 0x3c7   :  { %3348 = vmatpush3.bf16.msra.mxu0 %v1900_v44  ;;  %v3795_v44 = vld [vmem:[#allocation8 + $0x170] ss:$12 sps:$4 sm:$0xff]  }
 0x3c9   :  { %1963 = vmatmul.mubr.bf16.gmra.mrb[104].mxu1 %v3754_v32  ;;  %v3800_v32 = vld [vmem:[#allocation8 + $0x19c] ss:$12 sps:$4 sm:$0xff]  }
 0x3ca   :  { %1970 = vmatprep.mubr.bf16.mxu1 %v3755_v5  ;;  %v3801_v5 = vld [vmem:[#allocation8 + $0x1b8] ss:$12 sps:$4 sm:$0xff]  }
 0x3cc   :  { %v3335_v26 = vpop.f32.mrb[132].mxu0 }
 0x3cd   :  { %v1836_v6 = vpop.f32.mrb[133].mxu0 }
 0x3ce   :  { %v3336_v7 = vpop.f32.mrb[134].mxu0 }
 0x3cf   :  { %v1902_v34 = vpack.c.bf16 %v3336_v7, %v3335_v26  ;;  %v1839_v42 = vpop.f32.mrb[135].mxu0  ;;  %v3802_v26 = vld [vmem:[#allocation8 + $0x198] ss:$12 sps:$4 sm:$0xff]   ;;  %v3804_v7 = vld [vmem:[#allocation8 + $0x1d0] ss:$12 sps:$4 sm:$0xff]  }
 0x3d0   :  { %v1901_v9 = vpack.c.bf16 %v1839_v42, %v1836_v6  ;;  %v3803_v6 = vld [vmem:[#allocation8 + $0x1b4] ss:$12 sps:$4 sm:$0xff]   ;;  %v3806_v42 = vld [vmem:[#allocation8 + $0x1b0] ss:$12 sps:$4 sm:$0xff]  }
 0x3d1   :  { %1971 = vmatmul.mubr.bf16.gmra.mrb[108].mxu1 %v3756_v11  ;;  %v3808_v11 = vld [vmem:[#allocation8 + $0x200] ss:$12 sps:$4 sm:$0xff]  }
 0x3d2   :  { %1978 = vmatprep.mubr.bf16.mxu1 %v3757_v12  ;;  %3349 = vmatprep.subr.bf16.mxu0 %v1901_v9  ;;  %v3809_v12 = vld [vmem:[#allocation8 + $0x218] ss:$12 sps:$4 sm:$0xff]  }
 0x3d3   :  { %3350 = vmatpush3.bf16.msra.mxu0 %v1901_v9  ;;  %v3807_v9 = vld [vmem:[#allocation8 + $0x1cc] ss:$12 sps:$4 sm:$0xff]  }
 0x3d4   :  { %3351 = vmatprep.subr.bf16.mxu0 %v1902_v34 }
 0x3d7   :  { %3352 = vmatpush3.bf16.msra.mxu0 %v1902_v34  ;;  %v3805_v34 = vld [vmem:[#allocation8 + $0x1e8] ss:$12 sps:$4 sm:$0xff]  }
 0x3d9   :  { %1979 = vmatmul.mubr.bf16.gmra.mrb[112].mxu1 %v3758_v48  ;;  %v3810_v48 = vld [vmem:[#allocation8 + $0x1c8] ss:$12 sps:$4 sm:$0xff]  }
 0x3da   :  { %1986 = vmatprep.mubr.bf16.mxu1 %v3759_v13  ;;  %v3811_v13 = vld [vmem:[#allocation8 + $0x1e4] ss:$12 sps:$4 sm:$0xff]  }
 0x3dc   :  { %v3339_v33 = vpop.f32.mrb[136].mxu0 }
 0x3dd   :  { %v1852_v23 = vpop.f32.mrb[137].mxu0 }
 0x3de   :  { %v3340_v16 = vpop.f32.mrb[138].mxu0 }
 0x3df   :  { %v1904_v17 = vpack.c.bf16 %v3340_v16, %v3339_v33  ;;  %v1855_v30 = vpop.f32.mrb[139].mxu0  ;;  %v3812_v33 = vld [vmem:[#allocation8 + $0x230] ss:$12 sps:$4 sm:$0xff]  }
 0x3e0   :  { %v1903_v18 = vpack.c.bf16 %v1855_v30, %v1852_v23  ;;  %v3813_v23 = vld [vmem:[#allocation8 + $0x1e0] ss:$12 sps:$4 sm:$0xff]   ;;  %v3814_v16 = vld [vmem:[#allocation8 + $0x1fc] ss:$12 sps:$4 sm:$0xff]  }
 0x3e1   :  { %1987 = vmatmul.mubr.bf16.gmra.mrb[116].mxu1 %v3760_v19  ;;  %v3816_v30 = vld [vmem:[#allocation8 + $0x214] ss:$12 sps:$4 sm:$0xff]   ;;  %v3818_v19 = vld [vmem:[#allocation8 + $0x22c] ss:$12 sps:$4 sm:$0xff]  }
 0x3e2   :  { %1994 = vmatprep.mubr.bf16.mxu1 %v3761_v20  ;;  %3353 = vmatprep.subr.bf16.mxu0 %v1903_v18  ;;  %v3819_v20 = vld [vmem:[#allocation8 + $0x228] ss:$12 sps:$4 sm:$0xff]  }
 0x3e3   :  { %3354 = vmatpush3.bf16.msra.mxu0 %v1903_v18  ;;  %v3817_v18 = vld [vmem:[#allocation8 + $0x210] ss:$12 sps:$4 sm:$0xff]  }
 0x3e4   :  { %3355 = vmatprep.subr.bf16.mxu0 %v1904_v17 }
 0x3e7   :  { %3356 = vmatpush3.bf16.msra.mxu0 %v1904_v17  ;;  %v3815_v17 = vld [vmem:[#allocation8 + $0x1f8] ss:$12 sps:$4 sm:$0xff]  }
 0x3e9   :  { %1995 = vmatmul.mubr.bf16.gmra.mrb[120].mxu1 %v3762_v21 }
 0x3ea   :  { %2002 = vmatprep.mubr.bf16.mxu1 %v3763_v59 }
 0x3ec   :  { %v3343_v22 = vpop.f32.mrb[140].mxu0 }
 0x3ed   :  { %v1868_v24 = vpop.f32.mrb[141].mxu0 }
 0x3ee   :  { %v3344_v27 = vpop.f32.mrb[142].mxu0 }
 0x3ef   :  { %v1906_v0 = vpack.c.bf16 %v3344_v27, %v3343_v22  ;;  %v1871_v28 = vpop.f32.mrb[143].mxu0 }
 0x3f0   :  { %v1905_v29 = vpack.c.bf16 %v1871_v28, %v1868_v24 }
 0x3f1   :  { %2003 = vmatmul.mubr.bf16.gmra.mrb[124].mxu1 %v3764_v35 }
 0x3f2   :  { %3357 = vmatprep.subr.bf16.mxu0 %v1905_v29  ;;  %2010 = vmatprep.mubr.bf16.mxu1 %v3765_v36 }
 0x3f3   :  { %3358 = vmatpush3.bf16.msra.mxu0 %v1905_v29 }
 0x3f4   :  { %3359 = vmatprep.subr.bf16.mxu0 %v1906_v0 }
 0x3f7   :  { %3360 = vmatpush3.bf16.msra.mxu0 %v1906_v0 }
 0x3f9   :  { %2011 = vmatmul.mubr.bf16.gmra.mrb[128].mxu1 %v3766_v37 }
 0x3fa   :  { %3362 = vmatmul.mubr.bf16.vlgmr.msra.gmra.mrb[144].mxu0 %v3767_v57  ;;  %2018 = vmatprep.mubr.bf16.mxu1 %v3768_v38 }
 0x3fb   :  { %3365 = vmatprep.mubr.bf16.mxu0 %v3769_v39 }
 0x401   :  { %2019 = vmatmul.mubr.bf16.gmra.mrb[132].mxu1 %v3770_v40 }
 0x402   :  { %3366 = vmatmul.mubr.bf16.gmra.mrb[148].mxu0 %v3771_v63  ;;  %2026 = vmatprep.mubr.bf16.mxu1 %v3772_v41 }
 0x403   :  { %3369 = vmatprep.mubr.bf16.mxu0 %v3773_v43 }
 0x409   :  { %2027 = vmatmul.mubr.bf16.gmra.mrb[136].mxu1 %v3774_v25 }
 0x40a   :  { %3370 = vmatmul.mubr.bf16.gmra.mrb[152].mxu0 %v3775_v45  ;;  %2034 = vmatprep.mubr.bf16.mxu1 %v3776_v46 }
 0x40b   :  { %3373 = vmatprep.mubr.bf16.mxu0 %v3777_v47 }
 0x411   :  { %2035 = vmatmul.mubr.bf16.gmra.mrb[140].mxu1 %v3778_v50 }
 0x412   :  { %3374 = vmatmul.mubr.bf16.gmra.mrb[156].mxu0 %v3779_v10  ;;  %2042 = vmatprep.mubr.bf16.mxu1 %v3780_v51 }
 0x413   :  { %3377 = vmatprep.mubr.bf16.mxu0 %v3781_v52 }
 0x419   :  { %2043 = vmatmul.mubr.bf16.gmra.mrb[144].mxu1 %v3782_v31 }
 0x41a   :  { %3378 = vmatmul.mubr.bf16.gmra.mrb[160].mxu0 %v3783_v15  ;;  %2050 = vmatprep.mubr.bf16.mxu1 %v3784_v53 }
 0x41b   :  { %3381 = vmatprep.mubr.bf16.mxu0 %v3785_v54 }
 0x421   :  { %2051 = vmatmul.mubr.bf16.gmra.mrb[148].mxu1 %v3786_v55 }
 0x422   :  { %3382 = vmatmul.mubr.bf16.gmra.mrb[164].mxu0 %v3787_v56  ;;  %2058 = vmatprep.mubr.bf16.mxu1 %v3788_v58  ;;  %v4209_v58 = vld [vmem:[%s4670_s4] ss:$0 sm:$0xff]  ;;  %s3947_s4 = smov [#allocation10]  }
 0x423   :  { %3385 = vmatprep.mubr.bf16.mxu0 %v3789_v8  ;;  %s2897_s23 = sshll.u32 %s3947_s4, 4  ;;  %s2898_s23 = int_to_ptr.vmem [resolvable:$true] %s2897_s23 }
 0x424   :  { %s3908_s25 = scalar_lea.vmem %s2898_s23, 6144  ;;  %p3913_p5 = scmp.lt.s32.totalorder %s2898_s23, %s2898_s23 }
 0x425   :  { %p3909_p4 = scmp.ne.s32.totalorder %s2898_s23, %s3908_s25  ;;  %p3914_p6 = scmp.lt.s32.totalorder %s3908_s25, %s3908_s25 }
 0x427   :  { %p3915_p7 = por %p3914_p6, %p3913_p5 }
 0x429   :  { %2059 = vmatmul.mubr.bf16.gmra.mrb[152].mxu1 %v3790_v60  ;;  %p3916_p8 = pnand %p3915_p7, %p3909_p4 }
 0x42a   :  { %3386 = vmatmul.mubr.bf16.gmra.mrb[168].mxu0 %v3791_v61  ;;  %2066 = vmatprep.mubr.bf16.mxu1 %v3792_v62 }
 0x42b   :  { %3389 = vmatprep.mubr.bf16.mxu0 %v3793_v14 }
 0x431   :  { %2067 = vmatmul.mubr.bf16.gmra.mrb[156].mxu1 %v3794_v1 }
 0x432   :  { %3390 = vmatmul.mubr.bf16.gmra.mrb[172].mxu0 %v3795_v44  ;;  %2074 = vmatprep.mubr.bf16.mxu1 %v3796_v2 }
 0x433   :  { %3393 = vmatprep.mubr.bf16.mxu0 %v3797_v49 }
 0x439   :  { %2075 = vmatmul.mubr.bf16.gmra.mrb[160].mxu1 %v3798_v3 }
 0x43a   :  { %3394 = vmatmul.mubr.bf16.gmra.mrb[176].mxu0 %v3799_v4  ;;  %2082 = vmatprep.mubr.bf16.mxu1 %v3800_v32 }
 0x43b   :  { %3397 = vmatprep.mubr.bf16.mxu0 %v3801_v5 }
 0x441   :  { %2083 = vmatmul.mubr.bf16.gmra.mrb[164].mxu1 %v3802_v26 }
 0x442   :  { %2090 = vmatprep.mubr.bf16.mxu1 %v3803_v6  ;;  %3398 = vmatmul.mubr.bf16.gmra.mrb[180].mxu0 %v3804_v7 }
 0x443   :  { %3401 = vmatprep.mubr.bf16.mxu0 %v3805_v34 }
 0x449   :  { %2091 = vmatmul.mubr.bf16.gmra.mrb[168].mxu1 %v3806_v42 }
 0x44a   :  { %2098 = vmatprep.mubr.bf16.mxu1 %v3807_v9  ;;  %3402 = vmatmul.mubr.bf16.gmra.mrb[184].mxu0 %v3808_v11 }
 0x44b   :  { %3405 = vmatprep.mubr.bf16.mxu0 %v3809_v12 }
 0x451   :  { %2099 = vmatmul.mubr.bf16.gmra.mrb[172].mxu1 %v3810_v48 }
 0x452   :  { %2106 = vmatprep.mubr.bf16.mxu1 %v3811_v13  ;;  %3406 = vmatmul.mubr.bf16.gmra.mrb[188].mxu0 %v3812_v33 }
 0x459   :  { %2107 = vmatmul.mubr.bf16.gmra.mrb[176].mxu1 %v3813_v23 }
 0x45a   :  { %2114 = vmatprep.mubr.bf16.mxu1 %v3814_v16 }
 0x461   :  { %2115 = vmatmul.mubr.bf16.gmra.mrb[180].mxu1 %v3815_v17 }
 0x462   :  { %2122 = vmatprep.mubr.bf16.mxu1 %v3816_v30 }
 0x469   :  { %2123 = vmatmul.mubr.bf16.gmra.mrb[184].mxu1 %v3817_v18 }
 0x46a   :  { %2130 = vmatprep.mubr.bf16.mxu1 %v3818_v19 }
 0x471   :  { %2131 = vmatmul.mubr.bf16.gmra.mrb[188].mxu1 %v3819_v20 }
 0x48c   :  { %v1948_v21 = vpop.f32.mrb[96].mxu1 }
 0x48d   :  { %v1950_v59 = vpop.f32.mrb[97].mxu1  ;;  %v1949_v61 = vadd.f32 %v4209_v58, %v1948_v21 }
 0x48e   :  { %v1951_v22 = vpop.f32.mrb[98].mxu1 }
 0x48f   :  { %v1953_v24 = vpop.f32.mrb[99].mxu1  ;;  %v1952_v3 = vadd.f32 %v4209_v58, %v1951_v22 }
 0x494   :  { %v1956_v27 = vpop.f32.mrb[100].mxu1 }
 0x495   :  { %v1958_v0 = vpop.f32.mrb[101].mxu1  ;;  %v1957_v8 = vadd.f32 %v4209_v58, %v1956_v27 }
 0x496   :  { %v1959_v28 = vpop.f32.mrb[102].mxu1 }
 0x497   :  { %v1961_v29 = vpop.f32.mrb[103].mxu1  ;;  %v1960_v1 = vadd.f32 %v4209_v58, %v1959_v28 }
 0x49c   :  { %v1964_v35 = vpop.f32.mrb[104].mxu1 }
 0x49d   :  { %v1966_v36 = vpop.f32.mrb[105].mxu1  ;;  %v1965_v9 = vadd.f32 %v4209_v58, %v1964_v35 }
 0x49e   :  { %v1967_v37 = vpop.f32.mrb[106].mxu1 }
 0x49f   :  { %v1969_v57 = vpop.f32.mrb[107].mxu1  ;;  %v1968_v16 = vadd.f32 %v4209_v58, %v1967_v37 }
 0x4a4   :  { %v1972_v38 = vpop.f32.mrb[108].mxu1 }
 0x4a5   :  { %v1974_v39 = vpop.f32.mrb[109].mxu1  ;;  %v1973_v34 = vadd.f32 %v4209_v58, %v1972_v38 }
 0x4a6   :  { %v1975_v40 = vpop.f32.mrb[110].mxu1 }
 0x4a7   :  { %v1977_v63 = vpop.f32.mrb[111].mxu1  ;;  %v1976_v48 = vadd.f32 %v4209_v58, %v1975_v40 }
 0x4ac   :  { %v1980_v41 = vpop.f32.mrb[112].mxu1 }
 0x4ad   :  { %v1982_v43 = vpop.f32.mrb[113].mxu1  ;;  %v1981_v24 = vadd.f32 %v4209_v58, %v1980_v41 }
 0x4ae   :  { %v4196_v25 = vpop.f32.mrb[114].mxu1 }
 0x4af   :  { %v1985_v45 = vpop.f32.mrb[115].mxu1  ;;  %v1984_v37 = vadd.f32 %v4209_v58, %v4196_v25 }
 0x4b4   :  { %v1988_v46 = vpop.f32.mrb[116].mxu1 }
 0x4b5   :  { %v1990_v47 = vpop.f32.mrb[117].mxu1  ;;  %v1989_v59 = vadd.f32 %v4209_v58, %v1988_v46 }
 0x4b6   :  { %v1991_v50 = vpop.f32.mrb[118].mxu1 }
 0x4b7   :  { %v1993_v10 = vpop.f32.mrb[119].mxu1  ;;  %v1992_v28 = vadd.f32 %v4209_v58, %v1991_v50 }
 0x4bc   :  { %v4198_v51 = vpop.f32.mrb[120].mxu1 }
 0x4bd   :  { %v1998_v52 = vpop.f32.mrb[121].mxu1  ;;  %v1997_v25 = vadd.f32 %v4209_v58, %v4198_v51 }
 0x4be   :  { %v4200_v31 = vpop.f32.mrb[122].mxu1 }
 0x4bf   :  { %v2001_v15 = vpop.f32.mrb[123].mxu1 }
 0x4c4   :  { %v4202_v53 = vpop.f32.mrb[124].mxu1 }
 0x4c5   :  { %v2006_v54 = vpop.f32.mrb[125].mxu1  ;;  %v2005_v43 = vadd.f32 %v4209_v58, %v4202_v53  ;;  %v2000_v53 = vadd.f32 %v4209_v58, %v4200_v31 }
 0x4c6   :  { %v4204_v55 = vpop.f32.mrb[126].mxu1 }
 0x4c7   :  { %v2009_v56 = vpop.f32.mrb[127].mxu1  ;;  %v2008_v50 = vadd.f32 %v4209_v58, %v4204_v55 }
 0x4cc   :  { %v4212_v60 = vpop.f32.mrb[128].mxu1 }
 0x4cd   :  { %v3363_v62 = vpop.f32.mrb[144].mxu0  ;;  %v2014_v14 = vpop.f32.mrb[129].mxu1 }
 0x4ce   :  { %v4216_v44 = vadd.f32 %v3363_v62, %v1957_v8  ;;  %v2173_v2 = vpop.f32.mrb[145].mxu0  ;;  %v4218_v49 = vpop.f32.mrb[130].mxu1 }
 0x4cf   :  { %v4221_v4 = vadd.f32 %v2173_v2, %v1949_v61  ;;  %v3364_v32 = vpop.f32.mrb[146].mxu0  ;;  %v2017_v5 = vpop.f32.mrb[131].mxu1 }
 0x4d0   :  { %2368 = vmax.xlane.f32.xlu1 %v4216_v44  ;;  %v4224_v26 = vadd.f32 %v3364_v32, %v1960_v1  ;;  %v2176_v6 = vpop.f32.mrb[147].mxu0  ;;  %v2013_v1 = vadd.f32 %v4209_v58, %v4212_v60 }
 0x4d1   :  { %2364 = vmax.xlane.f32.xlu0 %v4221_v4  ;;  %v4227_v7 = vadd.f32 %v2176_v6, %v1952_v3 }
 0x4d4   :  { %2370 = vmax.xlane.f32.xlu1 %v4224_v26  ;;  %v2020_v42 = vpop.f32.mrb[132].mxu1 }
 0x4d5   :  { %v3367_v11 = vpop.f32.mrb[148].mxu0  ;;  %2366 = vmax.xlane.f32.xlu0 %v4227_v7  ;;  %v2022_v12 = vpop.f32.mrb[133].mxu1  ;;  %v2021_v55 = vadd.f32 %v4209_v58, %v2020_v42 }
 0x4d6   :  { %v4234_v13 = vadd.f32 %v3367_v11, %v1973_v34  ;;  %v2189_v33 = vpop.f32.mrb[149].mxu0  ;;  %v2023_v23 = vpop.f32.mrb[134].mxu1  ;;  %v2016_v34 = vadd.f32 %v4209_v58, %v4218_v49 }
 0x4d7   :  { %v4237_v17 = vadd.f32 %v2189_v33, %v1965_v9  ;;  %v3368_v30 = vpop.f32.mrb[150].mxu0  ;;  %v2025_v18 = vpop.f32.mrb[135].mxu1  ;;  %v2024_v3 = vadd.f32 %v4209_v58, %v2023_v23 }
 0x4d8   :  { %v4239_v19 = vadd.f32 %v3368_v30, %v1976_v48  ;;  %v2192_v20 = vpop.f32.mrb[151].mxu0 }
 0x4d9   :  { %2376 = vmax.xlane.f32.xlu0 %v4234_v13  ;;  %v4242_v21 = vadd.f32 %v2192_v20, %v1968_v16 }
 0x4da   :  { %2378 = vmax.xlane.f32.xlu1 %v4239_v19 }
 0x4dc   :  { %v2028_v22 = vpop.f32.mrb[136].mxu1 }
 0x4dd   :  { %v3371_v27 = vpop.f32.mrb[152].mxu0  ;;  %2372 = vmax.xlane.f32.xlu0 %v4237_v17  ;;  %v2030_v0 = vpop.f32.mrb[137].mxu1  ;;  %v2029_v16 = vadd.f32 %v4209_v58, %v2028_v22 }
 0x4de   :  { %v4249_v29 = vadd.f32 %v3371_v27, %v1989_v59  ;;  %v2205_v35 = vpop.f32.mrb[153].mxu0  ;;  %2374 = vmax.xlane.f32.xlu1 %v4242_v21  ;;  %v2031_v36 = vpop.f32.mrb[138].mxu1 }
 0x4df   :  { %v4254_v57 = vadd.f32 %v2205_v35, %v1981_v24  ;;  %v3372_v38 = vpop.f32.mrb[154].mxu0  ;;  %v2033_v39 = vpop.f32.mrb[139].mxu1  ;;  %v2032_v27 = vadd.f32 %v4209_v58, %v2031_v36 }
 0x4e0   :  { %v4256_v40 = vadd.f32 %v3372_v38, %v1992_v28  ;;  %v2208_v63 = vpop.f32.mrb[155].mxu0 }
 0x4e1   :  { %2384 = vmax.xlane.f32.xlu0 %v4249_v29  ;;  %v4259_v41 = vadd.f32 %v2208_v63, %v1984_v37 }
 0x4e2   :  { %2386 = vmax.xlane.f32.xlu1 %v4256_v40 }
 0x4e4   :  { %v2036_v45 = vpop.f32.mrb[140].mxu1 }
 0x4e5   :  { %v3375_v46 = vpop.f32.mrb[156].mxu0  ;;  %2380 = vmax.xlane.f32.xlu0 %v4254_v57  ;;  %v2038_v47 = vpop.f32.mrb[141].mxu1  ;;  %v2037_v33 = vadd.f32 %v4209_v58, %v2036_v45 }
 0x4e6   :  { %v4269_v10 = vadd.f32 %v3375_v46, %v2005_v43  ;;  %v2221_v52 = vpop.f32.mrb[157].mxu0  ;;  %2382 = vmax.xlane.f32.xlu1 %v4259_v41  ;;  %v2039_v15 = vpop.f32.mrb[142].mxu1 }
 0x4e7   :  { %v4274_v54 = vadd.f32 %v2221_v52, %v1997_v25  ;;  %v3376_v56 = vpop.f32.mrb[158].mxu0  ;;  %v2041_v51 = vpop.f32.mrb[143].mxu1  ;;  %v2040_v18 = vadd.f32 %v4209_v58, %v2039_v15 }
 0x4e8   :  { %v4276_v8 = vadd.f32 %v3376_v56, %v2008_v50  ;;  %v2224_v61 = vpop.f32.mrb[159].mxu0 }
 0x4e9   :  { %2392 = vmax.xlane.f32.xlu0 %v4269_v10  ;;  %v4279_v62 = vadd.f32 %v2224_v61, %v2000_v53 }
 0x4ea   :  { %2394 = vmax.xlane.f32.xlu1 %v4276_v8 }
 0x4ec   :  { %v2044_v14 = vpop.f32.mrb[144].mxu1 }
 0x4ed   :  { %v3379_v31 = vpop.f32.mrb[160].mxu0  ;;  %2388 = vmax.xlane.f32.xlu0 %v4274_v54  ;;  %v2046_v2 = vpop.f32.mrb[145].mxu1  ;;  %v2045_v43 = vadd.f32 %v4209_v58, %v2044_v14 }
 0x4ee   :  { %v4287_v32 = vadd.f32 %v3379_v31, %v2021_v55  ;;  %v2237_v5 = vpop.f32.mrb[161].mxu0  ;;  %2390 = vmax.xlane.f32.xlu1 %v4279_v62  ;;  %v2047_v6 = vpop.f32.mrb[146].mxu1 }
 0x4ef   :  { %v4292_v42 = vadd.f32 %v2237_v5, %v2013_v1  ;;  %v3380_v9 = vpop.f32.mrb[162].mxu0  ;;  %v2049_v11 = vpop.f32.mrb[147].mxu1  ;;  %v2048_v52 = vadd.f32 %v4209_v58, %v2047_v6 }
 0x4f0   :  { %v4294_v60 = vadd.f32 %v3380_v9, %v2024_v3  ;;  %v2240_v12 = vpop.f32.mrb[163].mxu0 }
 0x4f1   :  { %2400 = vmax.xlane.f32.xlu0 %v4287_v32  ;;  %v4297_v48 = vadd.f32 %v2240_v12, %v2016_v34 }
 0x4f2   :  { %2402 = vmax.xlane.f32.xlu1 %v4294_v60 }
 0x4f4   :  { %v2052_v23 = vpop.f32.mrb[148].mxu1 }
 0x4f5   :  { %v3383_v30 = vpop.f32.mrb[164].mxu0  ;;  %2396 = vmax.xlane.f32.xlu0 %v4292_v42  ;;  %v2054_v49 = vpop.f32.mrb[149].mxu1  ;;  %v2053_v39 = vadd.f32 %v4209_v58, %v2052_v23 }
 0x4f6   :  { %v4304_v20 = vadd.f32 %v3383_v30, %v2037_v33  ;;  %v2253_v59 = vpop.f32.mrb[165].mxu0  ;;  %2398 = vmax.xlane.f32.xlu1 %v4297_v48  ;;  %v2055_v24 = vpop.f32.mrb[150].mxu1 }
 0x4f7   :  { %v4308_v0 = vadd.f32 %v2253_v59, %v2029_v16  ;;  %v3384_v28 = vpop.f32.mrb[166].mxu0  ;;  %v2057_v35 = vpop.f32.mrb[151].mxu1  ;;  %v2056_v25 = vadd.f32 %v4209_v58, %v2055_v24 }
 0x4f8   :  { %v4310_v37 = vadd.f32 %v3384_v28, %v2040_v18  ;;  %v2256_v22 = vpop.f32.mrb[167].mxu0 }
 0x4f9   :  { %2408 = vmax.xlane.f32.xlu0 %v4304_v20  ;;  %v4313_v38 = vadd.f32 %v2256_v22, %v2032_v27 }
 0x4fa   :  { %2410 = vmax.xlane.f32.xlu1 %v4310_v37 }
 0x4fc   :  { %v2060_v63 = vpop.f32.mrb[152].mxu1 }
 0x4fd   :  { %v3387_v45 = vpop.f32.mrb[168].mxu0  ;;  %2404 = vmax.xlane.f32.xlu0 %v4308_v0  ;;  %v2062_v36 = vpop.f32.mrb[153].mxu1  ;;  %v2061_v1 = vadd.f32 %v4209_v58, %v2060_v63 }
 0x4fe   :  { %v4320_v46 = vadd.f32 %v3387_v45, %v2053_v39  ;;  %v2269_v47 = vpop.f32.mrb[169].mxu0  ;;  %2406 = vmax.xlane.f32.xlu1 %v4313_v38  ;;  %v2063_v50 = vpop.f32.mrb[154].mxu1 }
 0x4ff   :  { %v4324_v15 = vadd.f32 %v2269_v47, %v2045_v43  ;;  %v3388_v53 = vpop.f32.mrb[170].mxu0  ;;  %v2065_v56 = vpop.f32.mrb[155].mxu1  ;;  %v2064_v34 = vadd.f32 %v4209_v58, %v2063_v50 }
 0x500   :  { %v4326_v51 = vadd.f32 %v3388_v53, %v2056_v25  ;;  %v2272_v61 = vpop.f32.mrb[171].mxu0 }
 0x501   :  { %2416 = vmax.xlane.f32.xlu0 %v4320_v46  ;;  %v4329_v55 = vadd.f32 %v2272_v61, %v2048_v52 }
 0x502   :  { %2418 = vmax.xlane.f32.xlu1 %v4326_v51 }
 0x504   :  { %v2068_v14 = vpop.f32.mrb[156].mxu1 }
 0x505   :  { %v3391_v31 = vpop.f32.mrb[172].mxu0  ;;  %2412 = vmax.xlane.f32.xlu0 %v4324_v15  ;;  %v2069_v2 = vadd.f32 %v4209_v58, %v2068_v14  ;;  %v2070_v3 = vpop.f32.mrb[157].mxu1 }
 0x506   :  { %v2285_v5 = vpop.f32.mrb[173].mxu0  ;;  %2414 = vmax.xlane.f32.xlu1 %v4329_v55  ;;  %v2071_v6 = vpop.f32.mrb[158].mxu1 }
 0x507   :  { %v4337_v9 = vadd.f32 %v2285_v5, %v2061_v1  ;;  %v3392_v11 = vpop.f32.mrb[174].mxu0  ;;  %v2072_v12 = vadd.f32 %v4209_v58, %v2071_v6  ;;  %v2073_v33 = vpop.f32.mrb[159].mxu1  ;;  %v4340_v23 = vadd.f32 %v3391_v31, %v2069_v2 }
 0x508   :  { %v2288_v16 = vpop.f32.mrb[175].mxu0 }
 0x509   :  { %v4342_v30 = vadd.f32 %v2288_v16, %v2064_v34  ;;  %2420 = vmax.xlane.f32.xlu0 %v4337_v9  ;;  %v4345_v49 = vadd.f32 %v3392_v11, %v2072_v12 }
 0x50b   :  { %2422 = vmax.xlane.f32.xlu1 %v4342_v30 }
 0x50c   :  { %v2076_v18 = vpop.f32.mrb[160].mxu1 }
 0x50d   :  { %v2077_v59 = vadd.f32 %v4209_v58, %v2076_v18  ;;  %v2078_v24 = vpop.f32.mrb[161].mxu1  ;;  %v3395_v27 = vpop.f32.mrb[176].mxu0  ;;  %2424 = vmax.xlane.f32.xlu0 %v4340_v23 }
 0x50e   :  { %v2079_v28 = vpop.f32.mrb[162].mxu1  ;;  %v2301_v35 = vpop.f32.mrb[177].mxu0 }
 0x50f   :  { %v2080_v22 = vadd.f32 %v4209_v58, %v2079_v28  ;;  %v4351_v39 = vadd.f32 %v2301_v35, %v2077_v59  ;;  %v3396_v63 = vpop.f32.mrb[178].mxu0  ;;  %2426 = vmax.xlane.f32.xlu1 %v4345_v49  ;;  %v2081_v43 = vpop.f32.mrb[163].mxu1 }
 0x510   :  { %v2304_v45 = vpop.f32.mrb[179].mxu0 }
 0x511   :  { %v4354_v36 = vadd.f32 %v2304_v45, %v2080_v22  ;;  %2428 = vmax.xlane.f32.xlu0 %v4351_v39 }
 0x513   :  { %2430 = vmax.xlane.f32.xlu1 %v4354_v36 }
 0x514   :  { %v2084_v25 = vpop.f32.mrb[164].mxu1 }
 0x515   :  { %v2085_v47 = vadd.f32 %v4209_v58, %v2084_v25  ;;  %v2086_v50 = vpop.f32.mrb[165].mxu1  ;;  %v3399_v52 = vpop.f32.mrb[180].mxu0 }
 0x516   :  { %v2087_v53 = vpop.f32.mrb[166].mxu1  ;;  %v2317_v56 = vpop.f32.mrb[181].mxu0 }
 0x517   :  { %v2088_v61 = vadd.f32 %v4209_v58, %v2087_v53  ;;  %v4360_v14 = vadd.f32 %v3395_v27, %v2085_v47  ;;  %v2089_v1 = vpop.f32.mrb[167].mxu1  ;;  %v3400_v31 = vpop.f32.mrb[182].mxu0 }
 0x518   :  { %v2320_v2 = vpop.f32.mrb[183].mxu0 }
 0x519   :  { %2432 = vmax.xlane.f32.xlu0 %v4360_v14  ;;  %v4363_v3 = vadd.f32 %v3396_v63, %v2088_v61 }
 0x51b   :  { %2434 = vmax.xlane.f32.xlu1 %v4363_v3 }
 0x51c   :  { %v2092_v5 = vpop.f32.mrb[168].mxu1 }
 0x51d   :  { %v2093_v6 = vadd.f32 %v4209_v58, %v2092_v5  ;;  %v2094_v34 = vpop.f32.mrb[169].mxu1  ;;  %v3403_v11 = vpop.f32.mrb[184].mxu0 }
 0x51e   :  { %v2095_v12 = vpop.f32.mrb[170].mxu1  ;;  %v2333_v33 = vpop.f32.mrb[185].mxu0 }
 0x51f   :  { %v2096_v16 = vadd.f32 %v4209_v58, %v2095_v12  ;;  %v4368_v18 = vadd.f32 %v2317_v56, %v2093_v6  ;;  %v2097_v59 = vpop.f32.mrb[171].mxu1  ;;  %v3404_v24 = vpop.f32.mrb[186].mxu0 }
 0x520   :  { %v2336_v27 = vpop.f32.mrb[187].mxu0 }
 0x521   :  { %v4370_v28 = vadd.f32 %v2320_v2, %v2096_v16  ;;  %2436 = vmax.xlane.f32.xlu0 %v4368_v18 }
 0x523   :  { %2438 = vmax.xlane.f32.xlu1 %v4370_v28 }
 0x524   :  { %v2100_v35 = vpop.f32.mrb[172].mxu1 }
 0x525   :  { %v2101_v22 = vadd.f32 %v4209_v58, %v2100_v35  ;;  %v2102_v63 = vpop.f32.mrb[173].mxu1  ;;  %v3407_v43 = vpop.f32.mrb[188].mxu0 }
 0x526   :  { %v2103_v45 = vpop.f32.mrb[174].mxu1  ;;  %v2349_v25 = vpop.f32.mrb[189].mxu0 }
 0x527   :  { %v2104_v47 = vadd.f32 %v4209_v58, %v2103_v45  ;;  %v4376_v50 = vadd.f32 %v3399_v52, %v2101_v22  ;;  %v2105_v53 = vpop.f32.mrb[175].mxu1  ;;  %v3408_v56 = vpop.f32.mrb[190].mxu0 }
 0x528   :  { %v2352_v61 = vpop.f32.mrb[191].mxu0 }
 0x529   :  { %2440 = vmax.xlane.f32.xlu0 %v4376_v50  ;;  %v4379_v1 = vadd.f32 %v3400_v31, %v2104_v47 }
 0x52b   :  { %2442 = vmax.xlane.f32.xlu1 %v4379_v1 }
 0x52c   :  { %v2108_v2 = vpop.f32.mrb[176].mxu1 }
 0x52d   :  { %v2109_v5 = vadd.f32 %v4209_v58, %v2108_v2  ;;  %v2110_v6 = vpop.f32.mrb[177].mxu1 }
 0x52e   :  { %v2111_v34 = vpop.f32.mrb[178].mxu1 }
 0x52f   :  { %v2112_v12 = vadd.f32 %v4209_v58, %v2111_v34  ;;  %v4384_v16 = vadd.f32 %v2333_v33, %v2109_v5  ;;  %v2113_v52 = vpop.f32.mrb[179].mxu1 }
 0x531   :  { %v4386_v59 = vadd.f32 %v2336_v27, %v2112_v12  ;;  %2444 = vmax.xlane.f32.xlu0 %v4384_v16 }
 0x533   :  { %2446 = vmax.xlane.f32.xlu1 %v4386_v59 }
 0x534   :  { %v2116_v31 = vpop.f32.mrb[180].mxu1 }
 0x535   :  { %v2117_v35 = vadd.f32 %v4209_v58, %v2116_v31  ;;  %v2118_v22 = vpop.f32.mrb[181].mxu1 }
 0x536   :  { %v2119_v63 = vpop.f32.mrb[182].mxu1 }
 0x537   :  { %v2120_v45 = vadd.f32 %v4209_v58, %v2119_v63  ;;  %v4392_v47 = vadd.f32 %v3403_v11, %v2117_v35  ;;  %v2121_v53 = vpop.f32.mrb[183].mxu1 }
 0x539   :  { %2448 = vmax.xlane.f32.xlu0 %v4392_v47  ;;  %v4395_v33 = vadd.f32 %v3404_v24, %v2120_v45 }
 0x53b   :  { %2450 = vmax.xlane.f32.xlu1 %v4395_v33 }
 0x53c   :  { %v2124_v27 = vpop.f32.mrb[184].mxu1 }
 0x53d   :  { %v2125_v2 = vadd.f32 %v4209_v58, %v2124_v27  ;;  %v2126_v5 = vpop.f32.mrb[185].mxu1 }
 0x53e   :  { %v2127_v6 = vpop.f32.mrb[186].mxu1 }
 0x53f   :  { %v2128_v34 = vadd.f32 %v4209_v58, %v2127_v6  ;;  %v4400_v12 = vadd.f32 %v2349_v25, %v2125_v2  ;;  %v2129_v52 = vpop.f32.mrb[187].mxu1 }
 0x541   :  { %v4402_v31 = vadd.f32 %v2352_v61, %v2128_v34  ;;  %2452 = vmax.xlane.f32.xlu0 %v4400_v12 }
 0x543   :  { %2454 = vmax.xlane.f32.xlu1 %v4402_v31 }
 0x544   :  { %v2132_v11 = vpop.f32.mrb[188].mxu1 }
 0x545   :  { %v2133_v24 = vadd.f32 %v4209_v58, %v2132_v11  ;;  %v2134_v35 = vpop.f32.mrb[189].mxu1 }
 0x546   :  { %v2135_v22 = vpop.f32.mrb[190].mxu1 }
 0x547   :  { %v2136_v63 = vadd.f32 %v4209_v58, %v2135_v22  ;;  %v4408_v45 = vadd.f32 %v3407_v43, %v2133_v24  ;;  %v2137_v53 = vpop.f32.mrb[191].mxu1 }
 0x549   :  { %2456 = vmax.xlane.f32.xlu0 %v4408_v45  ;;  %v4411_v25 = vadd.f32 %v3408_v56, %v2136_v63 }
 0x54b   :  { %2458 = vmax.xlane.f32.xlu1 %v4411_v25 }
 0x55d   :  { %v2369_v61 = vpop.xlane.xlu1 %2368 }
 0x55e   :  { %v4415_v27 = vsub.f32 %v4216_v44, %v2369_v61  ;;  %v2365_v2 = vpop.xlane.xlu0 %2364 }
 0x55f   :  { %v4418_v5 = vsub.f32 %v4221_v4, %v2365_v2 }
 0x560   :  { %v2512_v6 = vmul.f32 1.442695, %v4415_v27 }
 0x561   :  { %v2508_v58 = vmul.f32 1.442695, %v4418_v5  ;;  %v2371_v43 = vpop.xlane.xlu1 %2370 }
 0x562   :  { %3557 = vpow2.f32 %v2512_v6  ;;  %v4423_v34 = vsub.f32 %v4224_v26, %v2371_v43  ;;  %v2367_v56 = vpop.xlane.xlu0 %2366 }
 0x563   :  { %v4426_v52 = vsub.f32 %v4227_v7, %v2367_v56  ;;  %3559 = vpow2.f32 %v2508_v58 }
 0x564   :  { %v2514_v44 = vmul.f32 1.442695, %v4423_v34 }
 0x565   :  { %v2510_v4 = vmul.f32 1.442695, %v4426_v52 }
 0x566   :  { %3561 = vpow2.f32 %v2514_v44  ;;  %v2377_v11 = vpop.xlane.xlu0 %2376 }
 0x567   :  { %v4431_v24 = vsub.f32 %v4234_v13, %v2377_v11  ;;  %v2379_v35 = vpop.xlane.xlu1 %2378  ;;  %3563 = vpow2.f32 %v2510_v4 }
 0x568   :  { %v4434_v22 = vsub.f32 %v4239_v19, %v2379_v35 }
 0x569   :  { %v2520_v26 = vmul.f32 1.442695, %v4431_v24 }
 0x56a   :  { %v2522_v7 = vmul.f32 1.442695, %v4434_v22  ;;  %v2373_v63 = vpop.xlane.xlu0 %2372 }
 0x56b   :  { %3565 = vpow2.f32 %v2520_v26  ;;  %v4439_v53 = vsub.f32 %v4237_v17, %v2373_v63  ;;  %v2375_v61 = vpop.xlane.xlu1 %2374 }
 0x56c   :  { %v3558_v2 = vpop.eup %3557  ;;  %v4442_v6 = vsub.f32 %v4242_v21, %v2375_v61  ;;  %3567 = vpow2.f32 %v2522_v7 }
 0x56d   :  { %v2516_v13 = vmul.f32 1.442695, %v4439_v53  ;;  %2608 = vadd.xlane.f32.xlu0 %v3558_v2  ;;  %v3560_v43 = vpop.eup %3559 }
 0x56e   :  { %v2518_v19 = vmul.f32 1.442695, %v4442_v6  ;;  %v2385_v58 = vpop.xlane.xlu0 %2384 }
 0x56f   :  { %3569 = vpow2.f32 %v2516_v13  ;;  %v4447_v56 = vsub.f32 %v4249_v29, %v2385_v58  ;;  %v2387_v44 = vpop.xlane.xlu1 %2386 }
 0x570   :  { %v3562_v17 = vpop.eup %3561  ;;  %v4450_v4 = vsub.f32 %v4256_v40, %v2387_v44  ;;  %3571 = vpow2.f32 %v2518_v19 }
 0x571   :  { %v2528_v21 = vmul.f32 1.442695, %v4447_v56  ;;  %2610 = vadd.xlane.f32.xlu1 %v3562_v17  ;;  %2604 = vadd.xlane.f32.xlu0 %v3560_v43  ;;  %v3564_v29 = vpop.eup %3563 }
 0x572   :  { %v2530_v11 = vmul.f32 1.442695, %v4450_v4  ;;  %v2381_v35 = vpop.xlane.xlu0 %2380 }
 0x573   :  { %3573 = vpow2.f32 %v2528_v21  ;;  %v4455_v26 = vsub.f32 %v4254_v57, %v2381_v35  ;;  %v2383_v7 = vpop.xlane.xlu1 %2382 }
 0x574   :  { %v4458_v63 = vsub.f32 %v4259_v41, %v2383_v7  ;;  %3575 = vpow2.f32 %v2530_v11 }
 0x575   :  { %v3566_v61 = vpop.eup %3565  ;;  %v2524_v40 = vmul.f32 1.442695, %v4455_v26  ;;  %2606 = vadd.xlane.f32.xlu1 %v3564_v29 }
 0x576   :  { %v2526_v2 = vmul.f32 1.442695, %v4458_v63  ;;  %2616 = vadd.xlane.f32.xlu0 %v3566_v61  ;;  %v2393_v13 = vpop.xlane.xlu0 %2392  ;;  %v3568_v58 = vpop.eup %3567 }
 0x577   :  { %3577 = vpow2.f32 %v2524_v40  ;;  %v4463_v19 = vsub.f32 %v4269_v10, %v2393_v13  ;;  %v2395_v57 = vpop.xlane.xlu1 %2394 }
 0x578   :  { %v4466_v43 = vsub.f32 %v4276_v8, %v2395_v57  ;;  %3579 = vpow2.f32 %v2526_v2 }
 0x579   :  { %v3570_v41 = vpop.eup %3569  ;;  %v2536_v44 = vmul.f32 1.442695, %v4463_v19  ;;  %2618 = vadd.xlane.f32.xlu1 %v3568_v58 }
 0x57a   :  { %v2538_v17 = vmul.f32 1.442695, %v4466_v43  ;;  %2612 = vadd.xlane.f32.xlu0 %v3570_v41  ;;  %v2389_v21 = vpop.xlane.xlu0 %2388  ;;  %v3572_v35 = vpop.eup %3571 }
 0x57b   :  { %3581 = vpow2.f32 %v2536_v44  ;;  %v4471_v11 = vsub.f32 %v4274_v54, %v2389_v21  ;;  %v2391_v10 = vpop.xlane.xlu1 %2390 }
 0x57c   :  { %v4474_v7 = vsub.f32 %v4279_v62, %v2391_v10  ;;  %3583 = vpow2.f32 %v2538_v17 }
 0x57d   :  { %v3574_v8 = vpop.eup %3573  ;;  %v2532_v29 = vmul.f32 1.442695, %v4471_v11  ;;  %2614 = vadd.xlane.f32.xlu1 %v3572_v35 }
 0x57e   :  { %v2534_v61 = vmul.f32 1.442695, %v4474_v7  ;;  %2624 = vadd.xlane.f32.xlu0 %v3574_v8  ;;  %v2401_v40 = vpop.xlane.xlu0 %2400  ;;  %v3576_v13 = vpop.eup %3575 }
 0x57f   :  { %3585 = vpow2.f32 %v2532_v29  ;;  %v4479_v2 = vsub.f32 %v4287_v32, %v2401_v40  ;;  %v2403_v54 = vpop.xlane.xlu1 %2402 }
 0x580   :  { %v4482_v57 = vsub.f32 %v4294_v60, %v2403_v54  ;;  %3587 = vpow2.f32 %v2534_v61 }
 0x581   :  { %v3578_v62 = vpop.eup %3577  ;;  %v2544_v58 = vmul.f32 1.442695, %v4479_v2  ;;  %2626 = vadd.xlane.f32.xlu1 %v3576_v13 }
 0x582   :  { %v2546_v41 = vmul.f32 1.442695, %v4482_v57  ;;  %2620 = vadd.xlane.f32.xlu0 %v3578_v62  ;;  %v2397_v44 = vpop.xlane.xlu0 %2396  ;;  %v3580_v21 = vpop.eup %3579 }
 0x583   :  { %3589 = vpow2.f32 %v2544_v58  ;;  %v4487_v17 = vsub.f32 %v4292_v42, %v2397_v44  ;;  %v2399_v32 = vpop.xlane.xlu1 %2398 }
 0x584   :  { %v4490_v10 = vsub.f32 %v4297_v48, %v2399_v32  ;;  %3591 = vpow2.f32 %v2546_v41 }
 0x585   :  { %v3582_v60 = vpop.eup %3581  ;;  %v2540_v35 = vmul.f32 1.442695, %v4487_v17  ;;  %2622 = vadd.xlane.f32.xlu1 %v3580_v21 }
 0x586   :  { %v2542_v8 = vmul.f32 1.442695, %v4490_v10  ;;  %2632 = vadd.xlane.f32.xlu0 %v3582_v60  ;;  %v2409_v29 = vpop.xlane.xlu0 %2408  ;;  %v3584_v40 = vpop.eup %3583 }
 0x587   :  { %3593 = vpow2.f32 %v2540_v35  ;;  %v4495_v61 = vsub.f32 %v4304_v20, %v2409_v29  ;;  %v2411_v42 = vpop.xlane.xlu1 %2410 }
 0x588   :  { %v4498_v54 = vsub.f32 %v4310_v37, %v2411_v42  ;;  %3595 = vpow2.f32 %v2542_v8 }
 0x589   :  { %v3586_v48 = vpop.eup %3585  ;;  %v2552_v13 = vmul.f32 1.442695, %v4495_v61  ;;  %2634 = vadd.xlane.f32.xlu1 %v3584_v40 }
 0x58a   :  { %v2554_v62 = vmul.f32 1.442695, %v4498_v54  ;;  %2628 = vadd.xlane.f32.xlu0 %v3586_v48  ;;  %v2405_v58 = vpop.xlane.xlu0 %2404  ;;  %v3588_v44 = vpop.eup %3587 }
 0x58b   :  { %3597 = vpow2.f32 %v2552_v13  ;;  %v4503_v41 = vsub.f32 %v4308_v0, %v2405_v58  ;;  %v2407_v20 = vpop.xlane.xlu1 %2406 }
 0x58c   :  { %v4506_v32 = vsub.f32 %v4313_v38, %v2407_v20  ;;  %3599 = vpow2.f32 %v2554_v62 }
 0x58d   :  { %v3590_v37 = vpop.eup %3589  ;;  %v2548_v21 = vmul.f32 1.442695, %v4503_v41  ;;  %2630 = vadd.xlane.f32.xlu1 %v3588_v44 }
 0x58e   :  { %v2550_v60 = vmul.f32 1.442695, %v4506_v32  ;;  %2640 = vadd.xlane.f32.xlu0 %v3590_v37  ;;  %v2417_v35 = vpop.xlane.xlu0 %2416  ;;  %v3592_v29 = vpop.eup %3591 }
 0x58f   :  { %3601 = vpow2.f32 %v2548_v21  ;;  %v4511_v8 = vsub.f32 %v4320_v46, %v2417_v35  ;;  %v2419_v0 = vpop.xlane.xlu1 %2418 }
 0x590   :  { %v4514_v42 = vsub.f32 %v4326_v51, %v2419_v0  ;;  %3603 = vpow2.f32 %v2550_v60 }
 0x591   :  { %v3594_v38 = vpop.eup %3593  ;;  %v2560_v40 = vmul.f32 1.442695, %v4511_v8  ;;  %2642 = vadd.xlane.f32.xlu1 %v3592_v29 }
 0x592   :  { %v2562_v48 = vmul.f32 1.442695, %v4514_v42  ;;  %2636 = vadd.xlane.f32.xlu0 %v3594_v38  ;;  %v2413_v13 = vpop.xlane.xlu0 %2412  ;;  %v3596_v58 = vpop.eup %3595 }
 0x593   :  { %3605 = vpow2.f32 %v2560_v40  ;;  %v4519_v62 = vsub.f32 %v4324_v15, %v2413_v13  ;;  %v2415_v46 = vpop.xlane.xlu1 %2414 }
 0x594   :  { %v4522_v20 = vsub.f32 %v4329_v55, %v2415_v46  ;;  %3607 = vpow2.f32 %v2562_v48 }
 0x595   :  { %v3598_v51 = vpop.eup %3597  ;;  %v2556_v44 = vmul.f32 1.442695, %v4519_v62  ;;  %2638 = vadd.xlane.f32.xlu1 %v3596_v58 }
 0x596   :  { %v2558_v37 = vmul.f32 1.442695, %v4522_v20  ;;  %2648 = vadd.xlane.f32.xlu0 %v3598_v51  ;;  %v2421_v21 = vpop.xlane.xlu0 %2420  ;;  %v3600_v15 = vpop.eup %3599 }
 0x597   :  { %3609 = vpow2.f32 %v2556_v44  ;;  %v4527_v60 = vsub.f32 %v4337_v9, %v2421_v21 }
 0x598   :  { %v2423_v35 = vpop.xlane.xlu1 %2422  ;;  %3611 = vpow2.f32 %v2558_v37 }
 0x599   :  { %v3602_v0 = vpop.eup %3601  ;;  %v2564_v29 = vmul.f32 1.442695, %v4527_v60  ;;  %v4531_v55 = vsub.f32 %v4342_v30, %v2423_v35  ;;  %2650 = vadd.xlane.f32.xlu1 %v3600_v15 }
 0x59a   :  { %2644 = vadd.xlane.f32.xlu0 %v3602_v0  ;;  %v2425_v38 = vpop.xlane.xlu0 %2424  ;;  %v3604_v9 = vpop.eup %3603 }
 0x59b   :  { %3613 = vpow2.f32 %v2564_v29  ;;  %v2566_v40 = vmul.f32 1.442695, %v4531_v55  ;;  %v4535_v48 = vsub.f32 %v4340_v23, %v2425_v38 }
 0x59c   :  { %v2427_v13 = vpop.xlane.xlu1 %2426 }
 0x59d   :  { %v3606_v46 = vpop.eup %3605  ;;  %3615 = vpow2.f32 %v2566_v40  ;;  %v2568_v58 = vmul.f32 1.442695, %v4535_v48  ;;  %v4539_v51 = vsub.f32 %v4345_v49, %v2427_v13  ;;  %2646 = vadd.xlane.f32.xlu1 %v3604_v9 }
 0x59e   :  { %2656 = vadd.xlane.f32.xlu0 %v3606_v46  ;;  %v2429_v30 = vpop.xlane.xlu0 %2428  ;;  %v3608_v23 = vpop.eup %3607 }
 0x59f   :  { %3617 = vpow2.f32 %v2568_v58  ;;  %v2570_v44 = vmul.f32 1.442695, %v4539_v51  ;;  %v4543_v37 = vsub.f32 %v4351_v39, %v2429_v30 }
 0x5a0   :  { %v2431_v21 = vpop.xlane.xlu1 %2430 }
 0x5a1   :  { %v3610_v15 = vpop.eup %3609  ;;  %3619 = vpow2.f32 %v2570_v44  ;;  %v2572_v35 = vmul.f32 1.442695, %v4543_v37  ;;  %v4547_v0 = vsub.f32 %v4354_v36, %v2431_v21  ;;  %2658 = vadd.xlane.f32.xlu1 %v3608_v23 }
 0x5a2   :  { %2652 = vadd.xlane.f32.xlu0 %v3610_v15  ;;  %v3612_v29 = vpop.eup %3611 }
 0x5a3   :  { %3621 = vpow2.f32 %v2572_v35  ;;  %v2574_v49 = vmul.f32 1.442695, %v4547_v0 }
 0x5a5   :  { %v3614_v38 = vpop.eup %3613  ;;  %3623 = vpow2.f32 %v2574_v49  ;;  %2654 = vadd.xlane.f32.xlu1 %v3612_v29 }
 0x5a6   :  { %2660 = vadd.xlane.f32.xlu0 %v3614_v38  ;;  %v2433_v39 = vpop.xlane.xlu0 %2432 }
 0x5a7   :  { %v3616_v40 = vpop.eup %3615  ;;  %v4551_v9 = vsub.f32 %v4360_v14, %v2433_v39 }
 0x5a8   :  { %v2435_v13 = vpop.xlane.xlu1 %2434 }
 0x5a9   :  { %v3618_v46 = vpop.eup %3617  ;;  %v2576_v36 = vmul.f32 1.442695, %v4551_v9  ;;  %v4555_v58 = vsub.f32 %v4363_v3, %v2435_v13  ;;  %2662 = vadd.xlane.f32.xlu1 %v3616_v40 }
 0x5aa   :  { %2664 = vadd.xlane.f32.xlu0 %v3618_v46 }
 0x5ab   :  { %v3620_v30 = vpop.eup %3619  ;;  %3625 = vpow2.f32 %v2576_v36  ;;  %v2578_v44 = vmul.f32 1.442695, %v4555_v58 }
 0x5ad   :  { %v3622_v23 = vpop.eup %3621  ;;  %3627 = vpow2.f32 %v2578_v44  ;;  %2666 = vadd.xlane.f32.xlu1 %v3620_v30 }
 0x5ae   :  { %2668 = vadd.xlane.f32.xlu0 %v3622_v23  ;;  %v2437_v21 = vpop.xlane.xlu0 %2436 }
 0x5af   :  { %v3624_v14 = vpop.eup %3623  ;;  %v4559_v15 = vsub.f32 %v4368_v18, %v2437_v21 }
 0x5b0   :  { %v2439_v35 = vpop.xlane.xlu1 %2438 }
 0x5b1   :  { %v2580_v49 = vmul.f32 1.442695, %v4559_v15  ;;  %v4563_v3 = vsub.f32 %v4370_v28, %v2439_v35  ;;  %2670 = vadd.xlane.f32.xlu1 %v3624_v14 }
 0x5b3   :  { %3629 = vpow2.f32 %v2580_v49  ;;  %v2582_v29 = vmul.f32 1.442695, %v4563_v3 }
 0x5b5   :  { %v3626_v38 = vpop.eup %3625  ;;  %3631 = vpow2.f32 %v2582_v29 }
 0x5b6   :  { %2672 = vadd.xlane.f32.xlu0 %v3626_v38  ;;  %v2441_v39 = vpop.xlane.xlu0 %2440 }
 0x5b7   :  { %v3628_v40 = vpop.eup %3627  ;;  %v4567_v13 = vsub.f32 %v4376_v50, %v2441_v39 }
 0x5b8   :  { %v2443_v18 = vpop.xlane.xlu1 %2442  ;;  %2674 = vadd.xlane.f32.xlu1 %v3628_v40 }
 0x5b9   :  { %v2584_v46 = vmul.f32 1.442695, %v4567_v13  ;;  %v4571_v36 = vsub.f32 %v4379_v1, %v2443_v18 }
 0x5bb   :  { %3633 = vpow2.f32 %v2584_v46  ;;  %v2586_v28 = vmul.f32 1.442695, %v4571_v36 }
 0x5bd   :  { %v3630_v30 = vpop.eup %3629  ;;  %3635 = vpow2.f32 %v2586_v28 }
 0x5be   :  { %2676 = vadd.xlane.f32.xlu0 %v3630_v30  ;;  %v2445_v44 = vpop.xlane.xlu0 %2444 }
 0x5bf   :  { %v3632_v23 = vpop.eup %3631  ;;  %v4575_v21 = vsub.f32 %v4384_v16, %v2445_v44 }
 0x5c0   :  { %v2447_v50 = vpop.xlane.xlu1 %2446  ;;  %2678 = vadd.xlane.f32.xlu1 %v3632_v23 }
 0x5c1   :  { %v2588_v14 = vmul.f32 1.442695, %v4575_v21  ;;  %v4579_v35 = vsub.f32 %v4386_v59, %v2447_v50 }
 0x5c3   :  { %3637 = vpow2.f32 %v2588_v14  ;;  %v2590_v1 = vmul.f32 1.442695, %v4579_v35 }
 0x5c5   :  { %v3634_v49 = vpop.eup %3633  ;;  %3639 = vpow2.f32 %v2590_v1 }
 0x5c6   :  { %2680 = vadd.xlane.f32.xlu0 %v3634_v49  ;;  %v2449_v29 = vpop.xlane.xlu0 %2448 }
 0x5c7   :  { %v3636_v38 = vpop.eup %3635  ;;  %v4583_v39 = vsub.f32 %v4392_v47, %v2449_v29 }
 0x5c8   :  { %v2451_v16 = vpop.xlane.xlu1 %2450  ;;  %2682 = vadd.xlane.f32.xlu1 %v3636_v38 }
 0x5c9   :  { %v2592_v40 = vmul.f32 1.442695, %v4583_v39  ;;  %v4587_v18 = vsub.f32 %v4395_v33, %v2451_v16 }
 0x5cb   :  { %3641 = vpow2.f32 %v2592_v40  ;;  %v2594_v59 = vmul.f32 1.442695, %v4587_v18 }
 0x5cd   :  { %v3638_v46 = vpop.eup %3637  ;;  %3643 = vpow2.f32 %v2594_v59 }
 0x5ce   :  { %2684 = vadd.xlane.f32.xlu0 %v3638_v46  ;;  %v2453_v28 = vpop.xlane.xlu0 %2452 }
 0x5cf   :  { %v3640_v30 = vpop.eup %3639  ;;  %v4591_v44 = vsub.f32 %v4400_v12, %v2453_v28 }
 0x5d0   :  { %v2455_v47 = vpop.xlane.xlu1 %2454  ;;  %2686 = vadd.xlane.f32.xlu1 %v3640_v30 }
 0x5d1   :  { %v2596_v23 = vmul.f32 1.442695, %v4591_v44  ;;  %v4595_v50 = vsub.f32 %v4402_v31, %v2455_v47 }
 0x5d3   :  { %3645 = vpow2.f32 %v2596_v23  ;;  %v2598_v33 = vmul.f32 1.442695, %v4595_v50 }
 0x5d5   :  { %v3642_v14 = vpop.eup %3641  ;;  %3647 = vpow2.f32 %v2598_v33 }
 0x5d6   :  { %2688 = vadd.xlane.f32.xlu0 %v3642_v14  ;;  %v2457_v1 = vpop.xlane.xlu0 %2456 }
 0x5d7   :  { %v3644_v49 = vpop.eup %3643  ;;  %v4599_v29 = vsub.f32 %v4408_v45, %v2457_v1 }
 0x5d8   :  { %v2459_v12 = vpop.xlane.xlu1 %2458  ;;  %2690 = vadd.xlane.f32.xlu1 %v3644_v49 }
 0x5d9   :  { %v2600_v38 = vmul.f32 1.442695, %v4599_v29  ;;  %v4603_v16 = vsub.f32 %v4411_v25, %v2459_v12 }
 0x5db   :  { %3649 = vpow2.f32 %v2600_v38  ;;  %v2602_v31 = vmul.f32 1.442695, %v4603_v16 }
 0x5dd   :  { %v3646_v40 = vpop.eup %3645  ;;  %3651 = vpow2.f32 %v2602_v31 }
 0x5de   :  { %2692 = vadd.xlane.f32.xlu0 %v3646_v40 }
 0x5df   :  { %v3648_v59 = vpop.eup %3647 }
 0x5e0   :  { %2694 = vadd.xlane.f32.xlu1 %v3648_v59 }
 0x5e5   :  { %v3650_v46 = vpop.eup %3649 }
 0x5e6   :  { %2696 = vadd.xlane.f32.xlu0 %v3650_v46 }
 0x5e7   :  { %v3652_v28 = vpop.eup %3651 }
 0x5e8   :  { %2698 = vadd.xlane.f32.xlu1 %v3652_v28 }
 0x5fa   :  { %v2609_v45 = vpop.xlane.xlu0 %2608 }
 0x5fb   :  { %3653 = vlog2.f32 %v2609_v45 }
 0x5fe   :  { %v2611_v30 = vpop.xlane.xlu1 %2610  ;;  %v2605_v47 = vpop.xlane.xlu0 %2604 }
 0x5ff   :  { %3655 = vlog2.f32 %v2611_v30 }
 0x600   :  { %3657 = vlog2.f32 %v2605_v47 }
 0x602   :  { %v2607_v25 = vpop.xlane.xlu1 %2606 }
 0x603   :  { %3659 = vlog2.f32 %v2607_v25  ;;  %v2617_v23 = vpop.xlane.xlu0 %2616 }
 0x604   :  { %3661 = vlog2.f32 %v2617_v23 }
 0x605   :  { %v3654_v33 = vpop.eup %3653 }
 0x606   :  { %v2705_v14 = vmul.f32 0.6931472, %v3654_v33  ;;  %v2619_v1 = vpop.xlane.xlu1 %2618 }
 0x607   :  { %3663 = vlog2.f32 %v2619_v1  ;;  %v2613_v49 = vpop.xlane.xlu0 %2612 }
 0x608   :  { %v2798_v12 = vsub.f32 %v4415_v27, %v2705_v14  ;;  %3665 = vlog2.f32 %v2613_v49 }
 0x609   :  { %v3656_v38 = vpop.eup %3655 }
 0x60a   :  { %v3658_v31 = vpop.eup %3657  ;;  %2846 = vst [vmem:[#allocation10 + $0x10] sm:$0xff] %v2798_v12  ;;  %v2707_v40 = vmul.f32 0.6931472, %v3656_v38  ;;  %v2615_v59 = vpop.xlane.xlu1 %2614 }
 0x60b   :  { %v2701_v46 = vmul.f32 0.6931472, %v3658_v31  ;;  %3667 = vlog2.f32 %v2615_v59  ;;  %v2625_v28 = vpop.xlane.xlu0 %2624 }
 0x60c   :  { %v2799_v45 = vsub.f32 %v4423_v34, %v2707_v40  ;;  %3669 = vlog2.f32 %v2625_v28 }
 0x60d   :  { %v3660_v30 = vpop.eup %3659  ;;  %v2796_v47 = vsub.f32 %v4418_v5, %v2701_v46 }
 0x60e   :  { %v3662_v25 = vpop.eup %3661  ;;  %2847 = vst [vmem:[#allocation10 + $0x18] sm:$0xff] %v2799_v45  ;;  %v2703_v23 = vmul.f32 0.6931472, %v3660_v30  ;;  %v2627_v33 = vpop.xlane.xlu1 %2626 }
 0x60f   :  { %2844 = vst [vmem:[#allocation10] sm:$0xff] %v2796_v47  ;;  %v2713_v27 = vmul.f32 0.6931472, %v3662_v25  ;;  %3671 = vlog2.f32 %v2627_v33  ;;  %v2621_v14 = vpop.xlane.xlu0 %2620 }
 0x610   :  { %v2797_v1 = vsub.f32 %v4426_v52, %v2703_v23  ;;  %3673 = vlog2.f32 %v2621_v14 }
 0x611   :  { %v3664_v49 = vpop.eup %3663  ;;  %v2802_v12 = vsub.f32 %v4431_v24, %v2713_v27 }
 0x612   :  { %v3666_v38 = vpop.eup %3665  ;;  %2845 = vst [vmem:[#allocation10 + $0x8] sm:$0xff] %v2797_v1  ;;  %v2715_v34 = vmul.f32 0.6931472, %v3664_v49  ;;  %v2623_v31 = vpop.xlane.xlu1 %2622 }
 0x613   :  { %2850 = vst [vmem:[#allocation10 + $0x30] sm:$0xff] %v2802_v12  ;;  %v2709_v5 = vmul.f32 0.6931472, %v3666_v38  ;;  %3675 = vlog2.f32 %v2623_v31  ;;  %v2633_v40 = vpop.xlane.xlu0 %2632 }
 0x614   :  { %v2803_v59 = vsub.f32 %v4434_v22, %v2715_v34  ;;  %3677 = vlog2.f32 %v2633_v40 }
 0x615   :  { %v3668_v46 = vpop.eup %3667  ;;  %v2800_v28 = vsub.f32 %v4439_v53, %v2709_v5 }
 0x616   :  { %v3670_v45 = vpop.eup %3669  ;;  %2851 = vst [vmem:[#allocation10 + $0x38] sm:$0xff] %v2803_v59  ;;  %v2711_v52 = vmul.f32 0.6931472, %v3668_v46  ;;  %v2635_v30 = vpop.xlane.xlu1 %2634 }
 0x617   :  { %2848 = vst [vmem:[#allocation10 + $0x20] sm:$0xff] %v2800_v28  ;;  %v2721_v24 = vmul.f32 0.6931472, %v3670_v45  ;;  %3679 = vlog2.f32 %v2635_v30  ;;  %v2629_v47 = vpop.xlane.xlu0 %2628 }
 0x618   :  { %v2801_v25 = vsub.f32 %v4442_v6, %v2711_v52  ;;  %3681 = vlog2.f32 %v2629_v47 }
 0x619   :  { %v3672_v23 = vpop.eup %3671  ;;  %v2806_v33 = vsub.f32 %v4447_v56, %v2721_v24 }
 0x61a   :  { %v3674_v27 = vpop.eup %3673  ;;  %2849 = vst [vmem:[#allocation10 + $0x28] sm:$0xff] %v2801_v25  ;;  %v2723_v22 = vmul.f32 0.6931472, %v3672_v23  ;;  %v2631_v14 = vpop.xlane.xlu1 %2630 }
 0x61b   :  { %2854 = vst [vmem:[#allocation10 + $0x50] sm:$0xff] %v2806_v33  ;;  %v2717_v53 = vmul.f32 0.6931472, %v3674_v27  ;;  %3683 = vlog2.f32 %v2631_v14  ;;  %v2641_v1 = vpop.xlane.xlu0 %2640 }
 0x61c   :  { %v2807_v49 = vsub.f32 %v4450_v4, %v2723_v22  ;;  %3685 = vlog2.f32 %v2641_v1 }
 0x61d   :  { %v3676_v12 = vpop.eup %3675  ;;  %v2804_v38 = vsub.f32 %v4455_v26, %v2717_v53 }
 0x61e   :  { %v3678_v34 = vpop.eup %3677  ;;  %2855 = vst [vmem:[#allocation10 + $0x58] sm:$0xff] %v2807_v49  ;;  %v2719_v6 = vmul.f32 0.6931472, %v3676_v12  ;;  %v2643_v31 = vpop.xlane.xlu1 %2642 }
 0x61f   :  { %2852 = vst [vmem:[#allocation10 + $0x40] sm:$0xff] %v2804_v38  ;;  %v2729_v56 = vmul.f32 0.6931472, %v3678_v34  ;;  %3687 = vlog2.f32 %v2643_v31  ;;  %v2637_v5 = vpop.xlane.xlu0 %2636 }
 0x620   :  { %v2805_v40 = vsub.f32 %v4458_v63, %v2719_v6  ;;  %3689 = vlog2.f32 %v2637_v5 }
 0x621   :  { %v3680_v59 = vpop.eup %3679  ;;  %v2810_v46 = vsub.f32 %v4463_v19, %v2729_v56 }
 0x622   :  { %v3682_v28 = vpop.eup %3681  ;;  %2853 = vst [vmem:[#allocation10 + $0x48] sm:$0xff] %v2805_v40  ;;  %v2731_v4 = vmul.f32 0.6931472, %v3680_v59  ;;  %v2639_v45 = vpop.xlane.xlu1 %2638 }
 0x623   :  { %2858 = vst [vmem:[#allocation10 + $0x70] sm:$0xff] %v2810_v46  ;;  %v2725_v26 = vmul.f32 0.6931472, %v3682_v28  ;;  %3691 = vlog2.f32 %v2639_v45  ;;  %v2649_v52 = vpop.xlane.xlu0 %2648 }
 0x624   :  { %v2811_v30 = vsub.f32 %v4466_v43, %v2731_v4  ;;  %3693 = vlog2.f32 %v2649_v52 }
 0x625   :  { %v3684_v24 = vpop.eup %3683  ;;  %v2808_v47 = vsub.f32 %v4471_v11, %v2725_v26 }
 0x626   :  { %v3686_v25 = vpop.eup %3685  ;;  %2859 = vst [vmem:[#allocation10 + $0x78] sm:$0xff] %v2811_v30  ;;  %v2727_v63 = vmul.f32 0.6931472, %v3684_v24  ;;  %v2651_v23 = vpop.xlane.xlu1 %2650 }
 0x627   :  { %2856 = vst [vmem:[#allocation10 + $0x60] sm:$0xff] %v2808_v47  ;;  %v2737_v19 = vmul.f32 0.6931472, %v3686_v25  ;;  %3695 = vlog2.f32 %v2651_v23  ;;  %v2645_v33 = vpop.xlane.xlu0 %2644 }
 0x628   :  { %v2809_v27 = vsub.f32 %v4474_v7, %v2727_v63  ;;  %3697 = vlog2.f32 %v2645_v33 }
 0x629   :  { %v3688_v22 = vpop.eup %3687  ;;  %v2814_v14 = vsub.f32 %v4479_v2, %v2737_v19 }
 0x62a   :  { %v3690_v53 = vpop.eup %3689  ;;  %2857 = vst [vmem:[#allocation10 + $0x68] sm:$0xff] %v2809_v27  ;;  %v2739_v43 = vmul.f32 0.6931472, %v3688_v22  ;;  %v2647_v1 = vpop.xlane.xlu1 %2646 }
 0x62b   :  { %2862 = vst [vmem:[#allocation10 + $0x90] sm:$0xff] %v2814_v14  ;;  %v2733_v11 = vmul.f32 0.6931472, %v3690_v53  ;;  %3699 = vlog2.f32 %v2647_v1  ;;  %v2657_v49 = vpop.xlane.xlu0 %2656 }
 0x62c   :  { %v2815_v12 = vsub.f32 %v4482_v57, %v2739_v43  ;;  %3701 = vlog2.f32 %v2657_v49 }
 0x62d   :  { %v3692_v38 = vpop.eup %3691  ;;  %v2812_v34 = vsub.f32 %v4487_v17, %v2733_v11 }
 0x62e   :  { %v3694_v6 = vpop.eup %3693  ;;  %2863 = vst [vmem:[#allocation10 + $0x98] sm:$0xff] %v2815_v12  ;;  %v2735_v7 = vmul.f32 0.6931472, %v3692_v38  ;;  %v2659_v31 = vpop.xlane.xlu1 %2658 }
 0x62f   :  { %2860 = vst [vmem:[#allocation10 + $0x80] sm:$0xff] %v2812_v34  ;;  %v2745_v2 = vmul.f32 0.6931472, %v3694_v6  ;;  %3703 = vlog2.f32 %v2659_v31  ;;  %v2653_v56 = vpop.xlane.xlu0 %2652 }
 0x630   :  { %v2813_v5 = vsub.f32 %v4490_v10, %v2735_v7  ;;  %3705 = vlog2.f32 %v2653_v56 }
 0x631   :  { %v3696_v40 = vpop.eup %3695  ;;  %v2818_v59 = vsub.f32 %v4495_v61, %v2745_v2 }
 0x632   :  { %v3698_v46 = vpop.eup %3697  ;;  %2861 = vst [vmem:[#allocation10 + $0x88] sm:$0xff] %v2813_v5  ;;  %v2747_v57 = vmul.f32 0.6931472, %v3696_v40  ;;  %v2655_v28 = vpop.xlane.xlu1 %2654 }
 0x633   :  { %2866 = vst [vmem:[#allocation10 + $0xb0] sm:$0xff] %v2818_v59  ;;  %v2741_v17 = vmul.f32 0.6931472, %v3698_v46  ;;  %3707 = vlog2.f32 %v2655_v28  ;;  %v2661_v4 = vpop.xlane.xlu0 %2660 }
 0x634   :  { %v2819_v45 = vsub.f32 %v4498_v54, %v2747_v57  ;;  %3709 = vlog2.f32 %v2661_v4 }
 0x635   :  { %v3700_v26 = vpop.eup %3699  ;;  %v2816_v52 = vsub.f32 %v4503_v41, %v2741_v17 }
 0x636   :  { %v3702_v30 = vpop.eup %3701  ;;  %2867 = vst [vmem:[#allocation10 + $0xb8] sm:$0xff] %v2819_v45  ;;  %v2743_v10 = vmul.f32 0.6931472, %v3700_v26  ;;  %v2663_v24 = vpop.xlane.xlu1 %2662 }
 0x637   :  { %2864 = vst [vmem:[#allocation10 + $0xa0] sm:$0xff] %v2816_v52  ;;  %v2753_v61 = vmul.f32 0.6931472, %v3702_v30  ;;  %3711 = vlog2.f32 %v2663_v24  ;;  %v2665_v47 = vpop.xlane.xlu0 %2664 }
 0x638   :  { %v2817_v25 = vsub.f32 %v4506_v32, %v2743_v10  ;;  %3713 = vlog2.f32 %v2665_v47 }
 0x639   :  { %v3704_v63 = vpop.eup %3703  ;;  %v2822_v23 = vsub.f32 %v4511_v8, %v2753_v61 }
 0x63a   :  { %v3706_v19 = vpop.eup %3705  ;;  %2865 = vst [vmem:[#allocation10 + $0xa8] sm:$0xff] %v2817_v25  ;;  %v2755_v54 = vmul.f32 0.6931472, %v3704_v63  ;;  %v2667_v33 = vpop.xlane.xlu1 %2666 }
 0x63b   :  { %2870 = vst [vmem:[#allocation10 + $0xd0] sm:$0xff] %v2822_v23  ;;  %v2749_v41 = vmul.f32 0.6931472, %v3706_v19  ;;  %3715 = vlog2.f32 %v2667_v33  ;;  %v2669_v27 = vpop.xlane.xlu0 %2668 }
 0x63c   :  { %v2823_v22 = vsub.f32 %v4514_v42, %v2755_v54  ;;  %3717 = vlog2.f32 %v2669_v27 }
 0x63d   :  { %v3708_v14 = vpop.eup %3707  ;;  %v2820_v53 = vsub.f32 %v4519_v62, %v2749_v41 }
 0x63e   :  { %v3710_v43 = vpop.eup %3709  ;;  %2871 = vst [vmem:[#allocation10 + $0xd8] sm:$0xff] %v2823_v22  ;;  %v2751_v32 = vmul.f32 0.6931472, %v3708_v14  ;;  %v2671_v1 = vpop.xlane.xlu1 %2670 }
 0x63f   :  { %2868 = vst [vmem:[#allocation10 + $0xc0] sm:$0xff] %v2820_v53  ;;  %v2757_v8 = vmul.f32 0.6931472, %v3710_v43  ;;  %3719 = vlog2.f32 %v2671_v1 }
 0x640   :  { %v2821_v11 = vsub.f32 %v4522_v20, %v2751_v32 }
 0x641   :  { %v3712_v49 = vpop.eup %3711  ;;  %v2824_v12 = vsub.f32 %v4527_v60, %v2757_v8 }
 0x642   :  { %v3714_v38 = vpop.eup %3713  ;;  %2869 = vst [vmem:[#allocation10 + $0xc8] sm:$0xff] %v2821_v11  ;;  %v2759_v34 = vmul.f32 0.6931472, %v3712_v49 }
 0x643   :  { %2872 = vst [vmem:[#allocation10 + $0xe0] sm:$0xff] %v2824_v12  ;;  %v2761_v42 = vmul.f32 0.6931472, %v3714_v38  ;;  %v2673_v6 = vpop.xlane.xlu0 %2672 }
 0x644   :  { %v2825_v62 = vsub.f32 %v4531_v55, %v2759_v34  ;;  %3721 = vlog2.f32 %v2673_v6 }
 0x645   :  { %v3716_v7 = vpop.eup %3715  ;;  %v2826_v31 = vsub.f32 %v4535_v48, %v2761_v42  ;;  %v2675_v2 = vpop.xlane.xlu1 %2674 }
 0x646   :  { %v3718_v56 = vpop.eup %3717  ;;  %2873 = vst [vmem:[#allocation10 + $0xe8] sm:$0xff] %v2825_v62  ;;  %v2763_v5 = vmul.f32 0.6931472, %v3716_v7  ;;  %3723 = vlog2.f32 %v2675_v2 }
 0x647   :  { %2874 = vst [vmem:[#allocation10 + $0xf0] sm:$0xff] %v2826_v31  ;;  %v2765_v20 = vmul.f32 0.6931472, %v3718_v56 }
 0x648   :  { %v2827_v60 = vsub.f32 %v4539_v51, %v2763_v5 }
 0x649   :  { %v3720_v40 = vpop.eup %3719  ;;  %v2828_v59 = vsub.f32 %v4543_v37, %v2765_v20 }
 0x64a   :  { %2875 = vst [vmem:[#allocation10 + $0xf8] sm:$0xff] %v2827_v60  ;;  %v2767_v46 = vmul.f32 0.6931472, %v3720_v40 }
 0x64b   :  { %2876 = vst [vmem:[#allocation10 + $0x100] sm:$0xff] %v2828_v59  ;;  %v2677_v55 = vpop.xlane.xlu0 %2676 }
 0x64c   :  { %v2829_v57 = vsub.f32 %v4547_v0, %v2767_v46  ;;  %3725 = vlog2.f32 %v2677_v55 }
 0x64d   :  { %v2679_v48 = vpop.xlane.xlu1 %2678 }
 0x64e   :  { %v3722_v28 = vpop.eup %3721  ;;  %2877 = vst [vmem:[#allocation10 + $0x108] sm:$0xff] %v2829_v57  ;;  %3727 = vlog2.f32 %v2679_v48 }
 0x64f   :  { %v2769_v17 = vmul.f32 0.6931472, %v3722_v28 }
 0x650   :  { %v3724_v4 = vpop.eup %3723 }
 0x651   :  { %v2830_v45 = vsub.f32 %v4551_v9, %v2769_v17  ;;  %v2771_v26 = vmul.f32 0.6931472, %v3724_v4 }
 0x653   :  { %2878 = vst [vmem:[#allocation10 + $0x110] sm:$0xff] %v2830_v45  ;;  %v2831_v51 = vsub.f32 %v4555_v58, %v2771_v26  ;;  %v2681_v37 = vpop.xlane.xlu0 %2680 }
 0x654   :  { %3729 = vlog2.f32 %v2681_v37 }
 0x655   :  { %2879 = vst [vmem:[#allocation10 + $0x118] sm:$0xff] %v2831_v51  ;;  %v2683_v52 = vpop.xlane.xlu1 %2682 }
 0x656   :  { %v3726_v30 = vpop.eup %3725  ;;  %3731 = vlog2.f32 %v2683_v52 }
 0x657   :  { %v2773_v0 = vmul.f32 0.6931472, %v3726_v30 }
 0x658   :  { %v3728_v10 = vpop.eup %3727 }
 0x659   :  { %v2832_v24 = vsub.f32 %v4559_v15, %v2773_v0  ;;  %v2775_v61 = vmul.f32 0.6931472, %v3728_v10 }
 0x65b   :  { %2880 = vst [vmem:[#allocation10 + $0x120] sm:$0xff] %v2832_v24  ;;  %v2833_v47 = vsub.f32 %v4563_v3, %v2775_v61  ;;  %v2685_v25 = vpop.xlane.xlu0 %2684 }
 0x65c   :  { %3733 = vlog2.f32 %v2685_v25 }
 0x65d   :  { %2881 = vst [vmem:[#allocation10 + $0x128] sm:$0xff] %v2833_v47  ;;  %v2687_v9 = vpop.xlane.xlu1 %2686 }
 0x65e   :  { %v3730_v63 = vpop.eup %3729  ;;  %3735 = vlog2.f32 %v2687_v9 }
 0x65f   :  { %v2777_v58 = vmul.f32 0.6931472, %v3730_v63 }
 0x660   :  { %v3732_v23 = vpop.eup %3731 }
 0x661   :  { %v2834_v19 = vsub.f32 %v4567_v13, %v2777_v58  ;;  %v2779_v54 = vmul.f32 0.6931472, %v3732_v23 }
 0x663   :  { %2882 = vst [vmem:[#allocation10 + $0x130] sm:$0xff] %v2834_v19  ;;  %v2835_v33 = vsub.f32 %v4571_v36, %v2779_v54  ;;  %v2689_v41 = vpop.xlane.xlu0 %2688 }
 0x664   :  { %3737 = vlog2.f32 %v2689_v41 }
 0x665   :  { %2883 = vst [vmem:[#allocation10 + $0x138] sm:$0xff] %v2835_v33  ;;  %v2691_v15 = vpop.xlane.xlu1 %2690 }
 0x666   :  { %v3734_v27 = vpop.eup %3733  ;;  %3739 = vlog2.f32 %v2691_v15 }
 0x667   :  { %v2781_v3 = vmul.f32 0.6931472, %v3734_v27 }
 0x668   :  { %v3736_v22 = vpop.eup %3735 }
 0x669   :  { %v2836_v14 = vsub.f32 %v4575_v21, %v2781_v3  ;;  %v2783_v53 = vmul.f32 0.6931472, %v3736_v22 }
 0x66b   :  { %2884 = vst [vmem:[#allocation10 + $0x140] sm:$0xff] %v2836_v14  ;;  %v2837_v43 = vsub.f32 %v4579_v35, %v2783_v53  ;;  %v2693_v32 = vpop.xlane.xlu0 %2692 }
 0x66c   :  { %3741 = vlog2.f32 %v2693_v32 }
 0x66d   :  { %2885 = vst [vmem:[#allocation10 + $0x148] sm:$0xff] %v2837_v43  ;;  %v2695_v13 = vpop.xlane.xlu1 %2694 }
 0x66e   :  { %v3738_v1 = vpop.eup %3737  ;;  %3743 = vlog2.f32 %v2695_v13 }
 0x66f   :  { %v2785_v36 = vmul.f32 0.6931472, %v3738_v1 }
 0x670   :  { %v3740_v8 = vpop.eup %3739 }
 0x671   :  { %v2838_v11 = vsub.f32 %v4583_v39, %v2785_v36  ;;  %v2787_v49 = vmul.f32 0.6931472, %v3740_v8 }
 0x673   :  { %2886 = vst [vmem:[#allocation10 + $0x150] sm:$0xff] %v2838_v11  ;;  %v2839_v12 = vsub.f32 %v4587_v18, %v2787_v49  ;;  %v2697_v38 = vpop.xlane.xlu0 %2696 }
 0x674   :  { %3745 = vlog2.f32 %v2697_v38 }
 0x675   :  { %2887 = vst [vmem:[#allocation10 + $0x158] sm:$0xff] %v2839_v12  ;;  %v2699_v21 = vpop.xlane.xlu1 %2698 }
 0x676   :  { %v3742_v34 = vpop.eup %3741  ;;  %3747 = vlog2.f32 %v2699_v21 }
 0x677   :  { %v2789_v35 = vmul.f32 0.6931472, %v3742_v34 }
 0x678   :  { %v3744_v42 = vpop.eup %3743 }
 0x679   :  { %v2840_v6 = vsub.f32 %v4591_v44, %v2789_v35  ;;  %v2791_v62 = vmul.f32 0.6931472, %v3744_v42 }
 0x67b   :  { %2888 = vst [vmem:[#allocation10 + $0x160] sm:$0xff] %v2840_v6  ;;  %v2841_v7 = vsub.f32 %v4595_v50, %v2791_v62 }
 0x67d   :  { %2889 = vst [vmem:[#allocation10 + $0x168] sm:$0xff] %v2841_v7 }
 0x67e   :  { %v3746_v39 = vpop.eup %3745 }
 0x67f   :  { %v2793_v31 = vmul.f32 0.6931472, %v3746_v39 }
 0x680   :  { %v3748_v2 = vpop.eup %3747 }
 0x681   :  { %v2842_v18 = vsub.f32 %v4599_v29, %v2793_v31  ;;  %v2795_v56 = vmul.f32 0.6931472, %v3748_v2 }
 0x683   :  { %2890 = vst [vmem:[#allocation10 + $0x170] sm:$0xff] %v2842_v18  ;;  %v2843_v5 = vsub.f32 %v4603_v16, %v2795_v56 }
 0x685   :  { %2891 = vst [vmem:[#allocation10 + $0x178] sm:$0xff] %v2843_v5 }
 0x686   :  { %3919 = shalt.err (!%p3916_p8)
}
 0x687   :  { %s3920_s28 = scalar_lea.hbm %s4672_s6, 6144 }
 0x688   :  { %p3921_p9 = scmp.ne.s32.totalorder %s4672_s6, %s3920_s28  ;;  %p3924_p10 = scmp.lt.u32.totalorder %s3920_s28, %s4672_s6 }
 0x68a   :  { %p3926_p11 = pnand %p3924_p10, %p3921_p9 }
 0x68c   :  { %3929 = shalt.err (!%p3926_p11)
}
 0x68d   :  { %s3948_s11 = smov 128   ;;  %s3949_s0 = smov 8  }
 0x68e   :  { %2903 = dma.vmem_to_hbm [thread:$0]  %s2898_s23, 6144, %s4672_s6, [#allocation4], %s3948_s11, %s3948_s11, %s3949_s0  }
 0x68f   :  { %3936 = dma.done.wait [#allocation4], 6144  }
 0x690   :  { %3937 = vsyncadd [#allocation4], 4294961152 }
 0x691   :  { %2907 = vsyncpa [#allocation3], 1 }
 0x692   :  { %2908 = vsyncpa [#allocation6], 1 }
 0x693   :  { %2909 = vsyncpa [#allocation9], 1 }
 0x694   :  { %2910 = vsyncpa [#allocation4], 1 }

</bundles_post_ra>
